<compile_context>
chip_gen: v7x
topology: tpu7x:2x2x1
jax: 0.10.0
libtpu: 0.0.40
codegen_flags: <defaults>
</compile_context>

<pallas_src>
import math

import jax
import jax.numpy as jnp
import numpy as np
from jax.experimental import pallas as pl
from jax.experimental.pallas import tpu as pltpu


# ----------------------------------------------------------------------------
# Fully fused model kernel: all LSTM layers + BN affines + FC + log_softmax.
# ----------------------------------------------------------------------------
def _make_ctc_kernel(T, B, H, num_class, num_layers):
    """Builds the fused forward kernel.

    Input ref order: x_slab (T*B, D),
                     [layer0: w_ih, w_hh],
                     [layer l>=1: scale, shift, w_ih, w_hh],
                     fc_scale, fc_shift, fc_w_padded.
    Then: out (T*B, C_pad), scratch xg (T*B, 4H), scratch hs (T*B, H).
    Gate columns of w_ih / w_hh are ordered i, f, g, o with the g columns
    pre-scaled by 2 (tanh(x) = 2*sigmoid(2x) - 1).
    """
    TB = T * B

    def kernel(*refs):
        x_ref = refs[0]
        hs_ref = refs[-1]                                   # (TB, H) scratch
        xg_ref = refs[-2]                                   # (TB, 4H) scratch
        o_ref = refs[-3]                                    # (TB, C_pad) out
        fc_scale_ref, fc_shift_ref, fc_w_ref = refs[-6:-3]
        layer_refs = refs[1:-6]

        cur = x_ref[...]                                    # (TB, D0)

        ptr = 0
        for layer in range(num_layers):
            if layer > 0:
                # eval-mode BatchNorm1d fused as one affine on the whole slab.
                scale = layer_refs[ptr][...]
                shift = layer_refs[ptr + 1][...]
                ptr += 2
                cur = cur * scale + shift
            w_ih = layer_refs[ptr][...]                     # (D_l, 4H)
            w_hh = layer_refs[ptr + 1][...]                 # (H, 4H)
            ptr += 2

            # Batched input projection: independent of the recurrence, one
            # sublane-filling matmul for all T steps.
            xg_ref[...] = jnp.dot(cur, w_ih, preferred_element_type=jnp.float32)

            def step(t, carry):
                h, c = carry
                g = xg_ref[pl.ds(t * B, B), :] + jnp.dot(
                    h, w_hh, preferred_element_type=jnp.float32)   # (B, 4H)
                # One full-slab EUP sigmoid; g-gate tanh via 2*sigmoid(2x)-1.
                s = jax.nn.sigmoid(g)
                i_g = s[:, 0 * H:1 * H]
                f_g = s[:, 1 * H:2 * H]
                g_g = 2.0 * s[:, 2 * H:3 * H] - 1.0
                o_g = s[:, 3 * H:4 * H]
                c_new = f_g * c + i_g * g_g
                h_new = o_g * jnp.tanh(c_new)
                hs_ref[pl.ds(t * B, B), :] = h_new
                return h_new, c_new

            h0 = jnp.zeros((B, H), jnp.float32)
            c0 = jnp.zeros((B, H), jnp.float32)
            jax.lax.fori_loop(0, T, step, (h0, c0), unroll=True)
            # TODO(synk): nn.Dropout(p=0.1) after each BatchRNN is identity in eval.
            cur = hs_ref[...]                               # (TB, H)

        # Head: BN affine -> Linear(bias=False) -> masked log_softmax, batched
        # over all T*B rows; single lane/sublane-dense output store.
        xf = cur * fc_scale_ref[...] + fc_shift_ref[...]
        logits = jnp.dot(xf, fc_w_ref[...],
                         preferred_element_type=jnp.float32)       # (TB, C_pad)
        c_pad = logits.shape[1]
        col = jax.lax.broadcasted_iota(jnp.int32, (TB, c_pad), 1)
        masked = jnp.where(col < num_class, logits, jnp.float32(-1e30))
        m = jnp.max(masked, axis=-1, keepdims=True)
        e = jnp.exp(masked - m)                   # padded columns underflow to 0
        lse = m + jnp.log(jnp.sum(e, axis=-1, keepdims=True))
        o_ref[...] = logits - lse                 # padded cols sliced off later

    return kernel


def ctc_model_forward(params, x_bse):
    """x: (batch, seq, feat) -> (seq, batch, num_class) log-probs."""
    Bsz, T, D = x_bse.shape
    x_slab = (jnp.transpose(x_bse, (1, 0, 2))
              .astype(jnp.float32)
              .reshape(T * Bsz, D))                                 # (T*B, D)

    layers = params["layers"]
    H = layers[0]["w_hh"].shape[0]
    C = params["fc_w"].shape[1]
    C_pad = pl.cdiv(C, 128) * 128

    fc_w_pad = jnp.zeros((H, C_pad), jnp.float32).at[:, :C].set(params["fc_w"])

    def prescale_g(w):
        # tanh(x) = 2*sigmoid(2x) - 1: fold the factor 2 into the g-gate
        # columns so the kernel uses one full-slab sigmoid per step.
        return w.at[:, 2 * H:3 * H].multiply(2.0)

    args = [x_slab]
    for idx, lyr in enumerate(layers):
        if idx > 0:
            args += [lyr["scale"], lyr["shift"]]
        args += [prescale_g(lyr["w_ih"]), prescale_g(lyr["w_hh"])]
    args += [params["fc_scale"], params["fc_shift"], fc_w_pad]

    kernel = _make_ctc_kernel(T, Bsz, H, C, len(layers))
    out_pad = pl.pallas_call(
        kernel,
        out_shape=jax.ShapeDtypeStruct((T * Bsz, C_pad), jnp.float32),
        in_specs=[pl.BlockSpec(memory_space=pltpu.MemorySpace.VMEM)
                  for _ in args],
        out_specs=pl.BlockSpec(memory_space=pltpu.MemorySpace.VMEM),
        scratch_shapes=[pltpu.VMEM((T * Bsz, 4 * H), jnp.float32),   # xg slab
                        pltpu.VMEM((T * Bsz, H), jnp.float32)],      # hs slab
    )(*args)
    return out_pad.reshape(T, Bsz, C_pad)[:, :, :C]          # (seq, batch, C)


# ----------------------------------------------------------------------------
# Parameter init (fused-gate layout: columns ordered i, f, g, o)
# ----------------------------------------------------------------------------
def init_params(key, input_size=32, hidden=32, rnn_layers=2, num_class=39):
    eps = 1e-5
    params = {"layers": []}
    keys = iter(jax.random.split(key, 4 * rnn_layers + 3))
    in_size = input_size
    for layer_idx in range(rnn_layers):
        k = 1.0 / math.sqrt(hidden)
        w_ih = jax.random.uniform(next(keys), (in_size, 4 * hidden),
                                  jnp.float32, -k, k)
        w_hh = jax.random.uniform(next(keys), (hidden, 4 * hidden),
                                  jnp.float32, -k, k)
        layer = dict(w_ih=w_ih, w_hh=w_hh)
        if layer_idx == 0:
            next(keys); next(keys)     # first BatchRNN has batch_norm=False
        else:
            gamma = 1.0 + 0.1 * jax.random.normal(next(keys), (1, in_size), jnp.float32)
            beta = 0.1 * jax.random.normal(next(keys), (1, in_size), jnp.float32)
            # eval-mode BN with running_mean=0, running_var=1
            layer["scale"] = gamma / jnp.sqrt(1.0 + eps)
            layer["shift"] = beta
        params["layers"].append(layer)
        in_size = hidden               # unidirectional -> num_directions * hidden

    feat = hidden
    gamma = 1.0 + 0.1 * jax.random.normal(next(keys), (1, feat), jnp.float32)
    beta = 0.1 * jax.random.normal(next(keys), (1, feat), jnp.float32)
    params["fc_scale"] = gamma / jnp.sqrt(1.0 + eps)
    params["fc_shift"] = beta
    kf = 1.0 / math.sqrt(feat)
    params["fc_w"] = jax.random.uniform(next(keys), (feat, num_class),
                                        jnp.float32, -kf, kf)
    return params


# ----------------------------------------------------------------------------
# Pure-JAX reference for validation
# ----------------------------------------------------------------------------
def _lstm_ref(x, w_ih, w_hh, scale=None, shift=None):
    T, B, D = x.shape
    H = w_hh.shape[0]

    def step(carry, xt):
        h, c = carry
        if scale is not None:
            xt = xt * scale + shift
        g = xt @ w_ih + h @ w_hh
        i = jax.nn.sigmoid(g[:, :H])
        f = jax.nn.sigmoid(g[:, H:2 * H])
        gg = jnp.tanh(g[:, 2 * H:3 * H])
        o = jax.nn.sigmoid(g[:, 3 * H:])
        c = f * c + i * gg
        h = o * jnp.tanh(c)
        return (h, c), h

    init = (jnp.zeros((B, H), jnp.float32), jnp.zeros((B, H), jnp.float32))
    _, hs = jax.lax.scan(step, init, x)
    return hs


def ctc_model_ref(params, x_bse):
    h = jnp.transpose(x_bse, (1, 0, 2)).astype(jnp.float32)
    for idx, lyr in enumerate(params["layers"]):
        if idx == 0:
            h = _lstm_ref(h, lyr["w_ih"], lyr["w_hh"])
        else:
            h = _lstm_ref(h, lyr["w_ih"], lyr["w_hh"], lyr["scale"], lyr["shift"])
    T, B, F = h.shape
    flat = h.reshape(T * B, F)
    flat = flat * params["fc_scale"] + params["fc_shift"]
    logits = flat @ params["fc_w"]
    out = jax.nn.log_softmax(logits, axis=-1)
    return out.reshape(T, B, -1)


if __name__ == "__main__":
    key = jax.random.PRNGKey(0)
    k_par, k_x = jax.random.split(key)

    batch, seq_len, feat = 2, 8, 32
    hidden, rnn_layers, num_class = 32, 2, 39

    params = init_params(k_par, input_size=feat, hidden=hidden,
                         rnn_layers=rnn_layers, num_class=num_class)
    x = jax.random.normal(k_x, (batch, seq_len, feat), jnp.float32)

    out = jax.block_until_ready(ctc_model_forward(params, x))
    ref = jax.block_until_ready(ctc_model_ref(params, x))

    assert out.shape == (seq_len, batch, num_class), out.shape
    np.testing.assert_allclose(np.asarray(out), np.asarray(ref),
                               rtol=1e-4, atol=1e-4)
    print("KERNEL_OK")
</pallas_src>

<mosaic_0001>
module attributes {stable_mosaic.version = 11 : i64} {
  func.func @kernel(%arg0: memref<16x32xf32, #tpu.memory_space<vmem>>, %arg1: memref<32x128xf32, #tpu.memory_space<vmem>>, %arg2: memref<32x128xf32, #tpu.memory_space<vmem>>, %arg3: memref<1x32xf32, #tpu.memory_space<vmem>>, %arg4: memref<1x32xf32, #tpu.memory_space<vmem>>, %arg5: memref<32x128xf32, #tpu.memory_space<vmem>>, %arg6: memref<32x128xf32, #tpu.memory_space<vmem>>, %arg7: memref<1x32xf32, #tpu.memory_space<vmem>>, %arg8: memref<1x32xf32, #tpu.memory_space<vmem>>, %arg9: memref<32x128xf32, #tpu.memory_space<vmem>>, %arg10: memref<16x128xf32, #tpu.memory_space<vmem>>, %arg11: memref<16x128xf32, #tpu.memory_space<vmem>>, %arg12: memref<16x32xf32, #tpu.memory_space<vmem>>) attributes {dimension_semantics = [], scalar_prefetch = 0 : i64, scratch_operands = 2 : i64, tpu.core_type = #tpu.core_type<tc>} {
    %c0 = arith.constant 0 : index
    %c0_0 = arith.constant 0 : index
    %0 = vector.load %arg0[%c0, %c0_0] : memref<16x32xf32, #tpu.memory_space<vmem>>, vector<16x32xf32>
    %c0_1 = arith.constant 0 : index
    %c0_2 = arith.constant 0 : index
    %1 = vector.load %arg1[%c0_1, %c0_2] : memref<32x128xf32, #tpu.memory_space<vmem>>, vector<32x128xf32>
    %c0_3 = arith.constant 0 : index
    %c0_4 = arith.constant 0 : index
    %2 = vector.load %arg2[%c0_3, %c0_4] : memref<32x128xf32, #tpu.memory_space<vmem>>, vector<32x128xf32>
    %cst = arith.constant dense<0.000000e+00> : vector<16x128xf32>
    %3 = tpu.matmul %0, %1, %cst {dimension_numbers = #tpu.dot_dimension_numbers<[1], [0], [0], [1], [0, 0, 1, 1], [], []>} : vector<16x32xf32>, vector<32x128xf32>, vector<16x128xf32> -> vector<16x128xf32>
    %c0_5 = arith.constant 0 : index
    %c0_6 = arith.constant 0 : index
    %4 = vector.load %arg11[%c0_5, %c0_6] : memref<16x128xf32, #tpu.memory_space<vmem>>, vector<16x128xf32>
    tpu.vector_store %arg11[%c0_5, %c0_6], %3 {strides = array<i32>} : memref<16x128xf32, #tpu.memory_space<vmem>>, vector<16x128xf32>,
    %cst_7 = arith.constant 0.000000e+00 : f32
    %5 = vector.broadcast %cst_7 : f32 to vector<2x32xf32>
    %cst_8 = arith.constant 0.000000e+00 : f32
    %6 = vector.broadcast %cst_8 : f32 to vector<2x32xf32>
    %c0_i32 = arith.constant 0 : i32
    %c2_i32 = arith.constant 2 : i32
    %7 = arith.muli %c0_i32, %c2_i32 : i32
    %8 = arith.index_cast %7 : i32 to index
    %c0_9 = arith.constant 0 : index
    %9 = vector.load %arg11[%8, %c0_9] : memref<16x128xf32, #tpu.memory_space<vmem>>, vector<2x128xf32>
    %cst_10 = arith.constant dense<0.000000e+00> : vector<2x128xf32>
    %10 = tpu.matmul %5, %2, %cst_10 {dimension_numbers = #tpu.dot_dimension_numbers<[1], [0], [0], [1], [0, 0, 1, 1], [], []>} : vector<2x32xf32>, vector<32x128xf32>, vector<2x128xf32> -> vector<2x128xf32>
    %11 = arith.addf %9, %10 : vector<2x128xf32>
    %12 = arith.negf %11 : vector<2x128xf32>
    %13 = math.exp %12 : vector<2x128xf32>
    %cst_11 = arith.constant 1.000000e+00 : f32
    %14 = vector.broadcast %cst_11 : f32 to vector<2x128xf32>
    %15 = arith.addf %14, %13 : vector<2x128xf32>
    %16 = arith.divf %14, %15 : vector<2x128xf32>
    %17 = vector.extract_strided_slice %16 {offsets = [0, 0], sizes = [2, 32], strides = [1, 1]} : vector<2x128xf32> to vector<2x32xf32>
    %18 = vector.extract_strided_slice %16 {offsets = [0, 32], sizes = [2, 32], strides = [1, 1]} : vector<2x128xf32> to vector<2x32xf32>
    %19 = vector.extract_strided_slice %16 {offsets = [0, 64], sizes = [2, 32], strides = [1, 1]} : vector<2x128xf32> to vector<2x32xf32>
    %cst_12 = arith.constant 2.000000e+00 : f32
    %20 = vector.broadcast %cst_12 : f32 to vector<2x32xf32>
    %21 = arith.mulf %20, %19 : vector<2x32xf32>
    %cst_13 = arith.constant 1.000000e+00 : f32
    %22 = vector.broadcast %cst_13 : f32 to vector<2x32xf32>
    %23 = arith.subf %21, %22 : vector<2x32xf32>
    %24 = vector.extract_strided_slice %16 {offsets = [0, 96], sizes = [2, 32], strides = [1, 1]} : vector<2x128xf32> to vector<2x32xf32>
    %25 = arith.mulf %18, %6 : vector<2x32xf32>
    %26 = arith.mulf %17, %23 : vector<2x32xf32>
    %27 = arith.addf %25, %26 : vector<2x32xf32>
    %28 = math.tanh %27 : vector<2x32xf32>
    %29 = arith.mulf %24, %28 : vector<2x32xf32>
    %c2_i32_14 = arith.constant 2 : i32
    %30 = arith.muli %c0_i32, %c2_i32_14 : i32
    %31 = arith.index_cast %30 : i32 to index
    %c0_15 = arith.constant 0 : index
    %32 = vector.load %arg12[%31, %c0_15] : memref<16x32xf32, #tpu.memory_space<vmem>>, vector<2x32xf32>
    tpu.vector_store %arg12[%31, %c0_15], %29 {strides = array<i32>} : memref<16x32xf32, #tpu.memory_space<vmem>>, vector<2x32xf32>,
    %c1_i32 = arith.constant 1 : i32
    %c2_i32_16 = arith.constant 2 : i32
    %33 = arith.muli %c1_i32, %c2_i32_16 : i32
    %34 = arith.index_cast %33 : i32 to index
    %c0_17 = arith.constant 0 : index
    %35 = vector.load %arg11[%34, %c0_17] : memref<16x128xf32, #tpu.memory_space<vmem>>, vector<2x128xf32>
    %cst_18 = arith.constant dense<0.000000e+00> : vector<2x128xf32>
    %36 = tpu.matmul %29, %2, %cst_18 {dimension_numbers = #tpu.dot_dimension_numbers<[1], [0], [0], [1], [0, 0, 1, 1], [], []>} : vector<2x32xf32>, vector<32x128xf32>, vector<2x128xf32> -> vector<2x128xf32>
    %37 = arith.addf %35, %36 : vector<2x128xf32>
    %38 = arith.negf %37 : vector<2x128xf32>
    %39 = math.exp %38 : vector<2x128xf32>
    %cst_19 = arith.constant 1.000000e+00 : f32
    %40 = vector.broadcast %cst_19 : f32 to vector<2x128xf32>
    %41 = arith.addf %40, %39 : vector<2x128xf32>
    %42 = arith.divf %40, %41 : vector<2x128xf32>
    %43 = vector.extract_strided_slice %42 {offsets = [0, 0], sizes = [2, 32], strides = [1, 1]} : vector<2x128xf32> to vector<2x32xf32>
    %44 = vector.extract_strided_slice %42 {offsets = [0, 32], sizes = [2, 32], strides = [1, 1]} : vector<2x128xf32> to vector<2x32xf32>
    %45 = vector.extract_strided_slice %42 {offsets = [0, 64], sizes = [2, 32], strides = [1, 1]} : vector<2x128xf32> to vector<2x32xf32>
    %cst_20 = arith.constant 2.000000e+00 : f32
    %46 = vector.broadcast %cst_20 : f32 to vector<2x32xf32>
    %47 = arith.mulf %46, %45 : vector<2x32xf32>
    %cst_21 = arith.constant 1.000000e+00 : f32
    %48 = vector.broadcast %cst_21 : f32 to vector<2x32xf32>
    %49 = arith.subf %47, %48 : vector<2x32xf32>
    %50 = vector.extract_strided_slice %42 {offsets = [0, 96], sizes = [2, 32], strides = [1, 1]} : vector<2x128xf32> to vector<2x32xf32>
    %51 = arith.mulf %44, %27 : vector<2x32xf32>
    %52 = arith.mulf %43, %49 : vector<2x32xf32>
    %53 = arith.addf %51, %52 : vector<2x32xf32>
    %54 = math.tanh %53 : vector<2x32xf32>
    %55 = arith.mulf %50, %54 : vector<2x32xf32>
    %c2_i32_22 = arith.constant 2 : i32
    %56 = arith.muli %c1_i32, %c2_i32_22 : i32
    %57 = arith.index_cast %56 : i32 to index
    %c0_23 = arith.constant 0 : index
    %58 = vector.load %arg12[%57, %c0_23] : memref<16x32xf32, #tpu.memory_space<vmem>>, vector<2x32xf32>
    tpu.vector_store %arg12[%57, %c0_23], %55 {strides = array<i32>} : memref<16x32xf32, #tpu.memory_space<vmem>>, vector<2x32xf32>,
    %c2_i32_24 = arith.constant 2 : i32
    %c2_i32_25 = arith.constant 2 : i32
    %59 = arith.muli %c2_i32_24, %c2_i32_25 : i32
    %60 = arith.index_cast %59 : i32 to index
    %c0_26 = arith.constant 0 : index
    %61 = vector.load %arg11[%60, %c0_26] : memref<16x128xf32, #tpu.memory_space<vmem>>, vector<2x128xf32>
    %cst_27 = arith.constant dense<0.000000e+00> : vector<2x128xf32>
    %62 = tpu.matmul %55, %2, %cst_27 {dimension_numbers = #tpu.dot_dimension_numbers<[1], [0], [0], [1], [0, 0, 1, 1], [], []>} : vector<2x32xf32>, vector<32x128xf32>, vector<2x128xf32> -> vector<2x128xf32>
    %63 = arith.addf %61, %62 : vector<2x128xf32>
    %64 = arith.negf %63 : vector<2x128xf32>
    %65 = math.exp %64 : vector<2x128xf32>
    %cst_28 = arith.constant 1.000000e+00 : f32
    %66 = vector.broadcast %cst_28 : f32 to vector<2x128xf32>
    %67 = arith.addf %66, %65 : vector<2x128xf32>
    %68 = arith.divf %66, %67 : vector<2x128xf32>
    %69 = vector.extract_strided_slice %68 {offsets = [0, 0], sizes = [2, 32], strides = [1, 1]} : vector<2x128xf32> to vector<2x32xf32>
    %70 = vector.extract_strided_slice %68 {offsets = [0, 32], sizes = [2, 32], strides = [1, 1]} : vector<2x128xf32> to vector<2x32xf32>
    %71 = vector.extract_strided_slice %68 {offsets = [0, 64], sizes = [2, 32], strides = [1, 1]} : vector<2x128xf32> to vector<2x32xf32>
    %cst_29 = arith.constant 2.000000e+00 : f32
    %72 = vector.broadcast %cst_29 : f32 to vector<2x32xf32>
    %73 = arith.mulf %72, %71 : vector<2x32xf32>
    %cst_30 = arith.constant 1.000000e+00 : f32
    %74 = vector.broadcast %cst_30 : f32 to vector<2x32xf32>
    %75 = arith.subf %73, %74 : vector<2x32xf32>
    %76 = vector.extract_strided_slice %68 {offsets = [0, 96], sizes = [2, 32], strides = [1, 1]} : vector<2x128xf32> to vector<2x32xf32>
    %77 = arith.mulf %70, %53 : vector<2x32xf32>
    %78 = arith.mulf %69, %75 : vector<2x32xf32>
    %79 = arith.addf %77, %78 : vector<2x32xf32>
    %80 = math.tanh %79 : vector<2x32xf32>
    %81 = arith.mulf %76, %80 : vector<2x32xf32>
    %c2_i32_31 = arith.constant 2 : i32
    %82 = arith.muli %c2_i32_24, %c2_i32_31 : i32
    %83 = arith.index_cast %82 : i32 to index
    %c0_32 = arith.constant 0 : index
    %84 = vector.load %arg12[%83, %c0_32] : memref<16x32xf32, #tpu.memory_space<vmem>>, vector<2x32xf32>
    tpu.vector_store %arg12[%83, %c0_32], %81 {strides = array<i32>} : memref<16x32xf32, #tpu.memory_space<vmem>>, vector<2x32xf32>,
    %c3_i32 = arith.constant 3 : i32
    %c2_i32_33 = arith.constant 2 : i32
    %85 = arith.muli %c3_i32, %c2_i32_33 : i32
    %86 = arith.index_cast %85 : i32 to index
    %c0_34 = arith.constant 0 : index
    %87 = vector.load %arg11[%86, %c0_34] : memref<16x128xf32, #tpu.memory_space<vmem>>, vector<2x128xf32>
    %cst_35 = arith.constant dense<0.000000e+00> : vector<2x128xf32>
    %88 = tpu.matmul %81, %2, %cst_35 {dimension_numbers = #tpu.dot_dimension_numbers<[1], [0], [0], [1], [0, 0, 1, 1], [], []>} : vector<2x32xf32>, vector<32x128xf32>, vector<2x128xf32> -> vector<2x128xf32>
    %89 = arith.addf %87, %88 : vector<2x128xf32>
    %90 = arith.negf %89 : vector<2x128xf32>
    %91 = math.exp %90 : vector<2x128xf32>
    %cst_36 = arith.constant 1.000000e+00 : f32
    %92 = vector.broadcast %cst_36 : f32 to vector<2x128xf32>
    %93 = arith.addf %92, %91 : vector<2x128xf32>
    %94 = arith.divf %92, %93 : vector<2x128xf32>
    %95 = vector.extract_strided_slice %94 {offsets = [0, 0], sizes = [2, 32], strides = [1, 1]} : vector<2x128xf32> to vector<2x32xf32>
    %96 = vector.extract_strided_slice %94 {offsets = [0, 32], sizes = [2, 32], strides = [1, 1]} : vector<2x128xf32> to vector<2x32xf32>
    %97 = vector.extract_strided_slice %94 {offsets = [0, 64], sizes = [2, 32], strides = [1, 1]} : vector<2x128xf32> to vector<2x32xf32>
    %cst_37 = arith.constant 2.000000e+00 : f32
    %98 = vector.broadcast %cst_37 : f32 to vector<2x32xf32>
    %99 = arith.mulf %98, %97 : vector<2x32xf32>
    %cst_38 = arith.constant 1.000000e+00 : f32
    %100 = vector.broadcast %cst_38 : f32 to vector<2x32xf32>
    %101 = arith.subf %99, %100 : vector<2x32xf32>
    %102 = vector.extract_strided_slice %94 {offsets = [0, 96], sizes = [2, 32], strides = [1, 1]} : vector<2x128xf32> to vector<2x32xf32>
    %103 = arith.mulf %96, %79 : vector<2x32xf32>
    %104 = arith.mulf %95, %101 : vector<2x32xf32>
    %105 = arith.addf %103, %104 : vector<2x32xf32>
    %106 = math.tanh %105 : vector<2x32xf32>
    %107 = arith.mulf %102, %106 : vector<2x32xf32>
    %c2_i32_39 = arith.constant 2 : i32
    %108 = arith.muli %c3_i32, %c2_i32_39 : i32
    %109 = arith.index_cast %108 : i32 to index
    %c0_40 = arith.constant 0 : index
    %110 = vector.load %arg12[%109, %c0_40] : memref<16x32xf32, #tpu.memory_space<vmem>>, vector<2x32xf32>
    tpu.vector_store %arg12[%109, %c0_40], %107 {strides = array<i32>} : memref<16x32xf32, #tpu.memory_space<vmem>>, vector<2x32xf32>,
    %c4_i32 = arith.constant 4 : i32
    %c2_i32_41 = arith.constant 2 : i32
    %111 = arith.muli %c4_i32, %c2_i32_41 : i32
    %112 = arith.index_cast %111 : i32 to index
    %c0_42 = arith.constant 0 : index
    %113 = vector.load %arg11[%112, %c0_42] : memref<16x128xf32, #tpu.memory_space<vmem>>, vector<2x128xf32>
    %cst_43 = arith.constant dense<0.000000e+00> : vector<2x128xf32>
    %114 = tpu.matmul %107, %2, %cst_43 {dimension_numbers = #tpu.dot_dimension_numbers<[1], [0], [0], [1], [0, 0, 1, 1], [], []>} : vector<2x32xf32>, vector<32x128xf32>, vector<2x128xf32> -> vector<2x128xf32>
    %115 = arith.addf %113, %114 : vector<2x128xf32>
    %116 = arith.negf %115 : vector<2x128xf32>
    %117 = math.exp %116 : vector<2x128xf32>
    %cst_44 = arith.constant 1.000000e+00 : f32
    %118 = vector.broadcast %cst_44 : f32 to vector<2x128xf32>
    %119 = arith.addf %118, %117 : vector<2x128xf32>
    %120 = arith.divf %118, %119 : vector<2x128xf32>
    %121 = vector.extract_strided_slice %120 {offsets = [0, 0], sizes = [2, 32], strides = [1, 1]} : vector<2x128xf32> to vector<2x32xf32>
    %122 = vector.extract_strided_slice %120 {offsets = [0, 32], sizes = [2, 32], strides = [1, 1]} : vector<2x128xf32> to vector<2x32xf32>
    %123 = vector.extract_strided_slice %120 {offsets = [0, 64], sizes = [2, 32], strides = [1, 1]} : vector<2x128xf32> to vector<2x32xf32>
    %cst_45 = arith.constant 2.000000e+00 : f32
    %124 = vector.broadcast %cst_45 : f32 to vector<2x32xf32>
    %125 = arith.mulf %124, %123 : vector<2x32xf32>
    %cst_46 = arith.constant 1.000000e+00 : f32
    %126 = vector.broadcast %cst_46 : f32 to vector<2x32xf32>
    %127 = arith.subf %125, %126 : vector<2x32xf32>
    %128 = vector.extract_strided_slice %120 {offsets = [0, 96], sizes = [2, 32], strides = [1, 1]} : vector<2x128xf32> to vector<2x32xf32>
    %129 = arith.mulf %122, %105 : vector<2x32xf32>
    %130 = arith.mulf %121, %127 : vector<2x32xf32>
    %131 = arith.addf %129, %130 : vector<2x32xf32>
    %132 = math.tanh %131 : vector<2x32xf32>
    %133 = arith.mulf %128, %132 : vector<2x32xf32>
    %c2_i32_47 = arith.constant 2 : i32
    %134 = arith.muli %c4_i32, %c2_i32_47 : i32
    %135 = arith.index_cast %134 : i32 to index
    %c0_48 = arith.constant 0 : index
    %136 = vector.load %arg12[%135, %c0_48] : memref<16x32xf32, #tpu.memory_space<vmem>>, vector<2x32xf32>
    tpu.vector_store %arg12[%135, %c0_48], %133 {strides = array<i32>} : memref<16x32xf32, #tpu.memory_space<vmem>>, vector<2x32xf32>,
    %c5_i32 = arith.constant 5 : i32
    %c2_i32_49 = arith.constant 2 : i32
    %137 = arith.muli %c5_i32, %c2_i32_49 : i32
    %138 = arith.index_cast %137 : i32 to index
    %c0_50 = arith.constant 0 : index
    %139 = vector.load %arg11[%138, %c0_50] : memref<16x128xf32, #tpu.memory_space<vmem>>, vector<2x128xf32>
    %cst_51 = arith.constant dense<0.000000e+00> : vector<2x128xf32>
    %140 = tpu.matmul %133, %2, %cst_51 {dimension_numbers = #tpu.dot_dimension_numbers<[1], [0], [0], [1], [0, 0, 1, 1], [], []>} : vector<2x32xf32>, vector<32x128xf32>, vector<2x128xf32> -> vector<2x128xf32>
    %141 = arith.addf %139, %140 : vector<2x128xf32>
    %142 = arith.negf %141 : vector<2x128xf32>
    %143 = math.exp %142 : vector<2x128xf32>
    %cst_52 = arith.constant 1.000000e+00 : f32
    %144 = vector.broadcast %cst_52 : f32 to vector<2x128xf32>
    %145 = arith.addf %144, %143 : vector<2x128xf32>
    %146 = arith.divf %144, %145 : vector<2x128xf32>
    %147 = vector.extract_strided_slice %146 {offsets = [0, 0], sizes = [2, 32], strides = [1, 1]} : vector<2x128xf32> to vector<2x32xf32>
    %148 = vector.extract_strided_slice %146 {offsets = [0, 32], sizes = [2, 32], strides = [1, 1]} : vector<2x128xf32> to vector<2x32xf32>
    %149 = vector.extract_strided_slice %146 {offsets = [0, 64], sizes = [2, 32], strides = [1, 1]} : vector<2x128xf32> to vector<2x32xf32>
    %cst_53 = arith.constant 2.000000e+00 : f32
    %150 = vector.broadcast %cst_53 : f32 to vector<2x32xf32>
    %151 = arith.mulf %150, %149 : vector<2x32xf32>
    %cst_54 = arith.constant 1.000000e+00 : f32
    %152 = vector.broadcast %cst_54 : f32 to vector<2x32xf32>
    %153 = arith.subf %151, %152 : vector<2x32xf32>
    %154 = vector.extract_strided_slice %146 {offsets = [0, 96], sizes = [2, 32], strides = [1, 1]} : vector<2x128xf32> to vector<2x32xf32>
    %155 = arith.mulf %148, %131 : vector<2x32xf32>
    %156 = arith.mulf %147, %153 : vector<2x32xf32>
    %157 = arith.addf %155, %156 : vector<2x32xf32>
    %158 = math.tanh %157 : vector<2x32xf32>
    %159 = arith.mulf %154, %158 : vector<2x32xf32>
    %c2_i32_55 = arith.constant 2 : i32
    %160 = arith.muli %c5_i32, %c2_i32_55 : i32
    %161 = arith.index_cast %160 : i32 to index
    %c0_56 = arith.constant 0 : index
    %162 = vector.load %arg12[%161, %c0_56] : memref<16x32xf32, #tpu.memory_space<vmem>>, vector<2x32xf32>
    tpu.vector_store %arg12[%161, %c0_56], %159 {strides = array<i32>} : memref<16x32xf32, #tpu.memory_space<vmem>>, vector<2x32xf32>,
    %c6_i32 = arith.constant 6 : i32
    %c2_i32_57 = arith.constant 2 : i32
    %163 = arith.muli %c6_i32, %c2_i32_57 : i32
    %164 = arith.index_cast %163 : i32 to index
    %c0_58 = arith.constant 0 : index
    %165 = vector.load %arg11[%164, %c0_58] : memref<16x128xf32, #tpu.memory_space<vmem>>, vector<2x128xf32>
    %cst_59 = arith.constant dense<0.000000e+00> : vector<2x128xf32>
    %166 = tpu.matmul %159, %2, %cst_59 {dimension_numbers = #tpu.dot_dimension_numbers<[1], [0], [0], [1], [0, 0, 1, 1], [], []>} : vector<2x32xf32>, vector<32x128xf32>, vector<2x128xf32> -> vector<2x128xf32>
    %167 = arith.addf %165, %166 : vector<2x128xf32>
    %168 = arith.negf %167 : vector<2x128xf32>
    %169 = math.exp %168 : vector<2x128xf32>
    %cst_60 = arith.constant 1.000000e+00 : f32
    %170 = vector.broadcast %cst_60 : f32 to vector<2x128xf32>
    %171 = arith.addf %170, %169 : vector<2x128xf32>
    %172 = arith.divf %170, %171 : vector<2x128xf32>
    %173 = vector.extract_strided_slice %172 {offsets = [0, 0], sizes = [2, 32], strides = [1, 1]} : vector<2x128xf32> to vector<2x32xf32>
    %174 = vector.extract_strided_slice %172 {offsets = [0, 32], sizes = [2, 32], strides = [1, 1]} : vector<2x128xf32> to vector<2x32xf32>
    %175 = vector.extract_strided_slice %172 {offsets = [0, 64], sizes = [2, 32], strides = [1, 1]} : vector<2x128xf32> to vector<2x32xf32>
    %cst_61 = arith.constant 2.000000e+00 : f32
    %176 = vector.broadcast %cst_61 : f32 to vector<2x32xf32>
    %177 = arith.mulf %176, %175 : vector<2x32xf32>
    %cst_62 = arith.constant 1.000000e+00 : f32
    %178 = vector.broadcast %cst_62 : f32 to vector<2x32xf32>
    %179 = arith.subf %177, %178 : vector<2x32xf32>
    %180 = vector.extract_strided_slice %172 {offsets = [0, 96], sizes = [2, 32], strides = [1, 1]} : vector<2x128xf32> to vector<2x32xf32>
    %181 = arith.mulf %174, %157 : vector<2x32xf32>
    %182 = arith.mulf %173, %179 : vector<2x32xf32>
    %183 = arith.addf %181, %182 : vector<2x32xf32>
    %184 = math.tanh %183 : vector<2x32xf32>
    %185 = arith.mulf %180, %184 : vector<2x32xf32>
    %c2_i32_63 = arith.constant 2 : i32
    %186 = arith.muli %c6_i32, %c2_i32_63 : i32
    %187 = arith.index_cast %186 : i32 to index
    %c0_64 = arith.constant 0 : index
    %188 = vector.load %arg12[%187, %c0_64] : memref<16x32xf32, #tpu.memory_space<vmem>>, vector<2x32xf32>
    tpu.vector_store %arg12[%187, %c0_64], %185 {strides = array<i32>} : memref<16x32xf32, #tpu.memory_space<vmem>>, vector<2x32xf32>,
    %c7_i32 = arith.constant 7 : i32
    %c2_i32_65 = arith.constant 2 : i32
    %189 = arith.muli %c7_i32, %c2_i32_65 : i32
    %190 = arith.index_cast %189 : i32 to index
    %c0_66 = arith.constant 0 : index
    %191 = vector.load %arg11[%190, %c0_66] : memref<16x128xf32, #tpu.memory_space<vmem>>, vector<2x128xf32>
    %cst_67 = arith.constant dense<0.000000e+00> : vector<2x128xf32>
    %192 = tpu.matmul %185, %2, %cst_67 {dimension_numbers = #tpu.dot_dimension_numbers<[1], [0], [0], [1], [0, 0, 1, 1], [], []>} : vector<2x32xf32>, vector<32x128xf32>, vector<2x128xf32> -> vector<2x128xf32>
    %193 = arith.addf %191, %192 : vector<2x128xf32>
    %194 = arith.negf %193 : vector<2x128xf32>
    %195 = math.exp %194 : vector<2x128xf32>
    %cst_68 = arith.constant 1.000000e+00 : f32
    %196 = vector.broadcast %cst_68 : f32 to vector<2x128xf32>
    %197 = arith.addf %196, %195 : vector<2x128xf32>
    %198 = arith.divf %196, %197 : vector<2x128xf32>
    %199 = vector.extract_strided_slice %198 {offsets = [0, 0], sizes = [2, 32], strides = [1, 1]} : vector<2x128xf32> to vector<2x32xf32>
    %200 = vector.extract_strided_slice %198 {offsets = [0, 32], sizes = [2, 32], strides = [1, 1]} : vector<2x128xf32> to vector<2x32xf32>
    %201 = vector.extract_strided_slice %198 {offsets = [0, 64], sizes = [2, 32], strides = [1, 1]} : vector<2x128xf32> to vector<2x32xf32>
    %cst_69 = arith.constant 2.000000e+00 : f32
    %202 = vector.broadcast %cst_69 : f32 to vector<2x32xf32>
    %203 = arith.mulf %202, %201 : vector<2x32xf32>
    %cst_70 = arith.constant 1.000000e+00 : f32
    %204 = vector.broadcast %cst_70 : f32 to vector<2x32xf32>
    %205 = arith.subf %203, %204 : vector<2x32xf32>
    %206 = vector.extract_strided_slice %198 {offsets = [0, 96], sizes = [2, 32], strides = [1, 1]} : vector<2x128xf32> to vector<2x32xf32>
    %207 = arith.mulf %200, %183 : vector<2x32xf32>
    %208 = arith.mulf %199, %205 : vector<2x32xf32>
    %209 = arith.addf %207, %208 : vector<2x32xf32>
    %210 = math.tanh %209 : vector<2x32xf32>
    %211 = arith.mulf %206, %210 : vector<2x32xf32>
    %c2_i32_71 = arith.constant 2 : i32
    %212 = arith.muli %c7_i32, %c2_i32_71 : i32
    %213 = arith.index_cast %212 : i32 to index
    %c0_72 = arith.constant 0 : index
    %214 = vector.load %arg12[%213, %c0_72] : memref<16x32xf32, #tpu.memory_space<vmem>>, vector<2x32xf32>
    tpu.vector_store %arg12[%213, %c0_72], %211 {strides = array<i32>} : memref<16x32xf32, #tpu.memory_space<vmem>>, vector<2x32xf32>,
    %c8_i32 = arith.constant 8 : i32
    %c0_73 = arith.constant 0 : index
    %c0_74 = arith.constant 0 : index
    %215 = vector.load %arg12[%c0_73, %c0_74] : memref<16x32xf32, #tpu.memory_space<vmem>>, vector<16x32xf32>
    %c0_75 = arith.constant 0 : index
    %c0_76 = arith.constant 0 : index
    %216 = vector.load %arg3[%c0_75, %c0_76] : memref<1x32xf32, #tpu.memory_space<vmem>>, vector<1x32xf32>
    %c0_77 = arith.constant 0 : index
    %c0_78 = arith.constant 0 : index
    %217 = vector.load %arg4[%c0_77, %c0_78] : memref<1x32xf32, #tpu.memory_space<vmem>>, vector<1x32xf32>
    %218 = vector.broadcast %216 : vector<1x32xf32> to vector<16x32xf32>
    %219 = arith.mulf %215, %218 : vector<16x32xf32>
    %220 = vector.broadcast %217 : vector<1x32xf32> to vector<16x32xf32>
    %221 = arith.addf %219, %220 : vector<16x32xf32>
    %c0_79 = arith.constant 0 : index
    %c0_80 = arith.constant 0 : index
    %222 = vector.load %arg5[%c0_79, %c0_80] : memref<32x128xf32, #tpu.memory_space<vmem>>, vector<32x128xf32>
    %c0_81 = arith.constant 0 : index
    %c0_82 = arith.constant 0 : index
    %223 = vector.load %arg6[%c0_81, %c0_82] : memref<32x128xf32, #tpu.memory_space<vmem>>, vector<32x128xf32>
    %cst_83 = arith.constant dense<0.000000e+00> : vector<16x128xf32>
    %224 = tpu.matmul %221, %222, %cst_83 {dimension_numbers = #tpu.dot_dimension_numbers<[1], [0], [0], [1], [0, 0, 1, 1], [], []>} : vector<16x32xf32>, vector<32x128xf32>, vector<16x128xf32> -> vector<16x128xf32>
    %c0_84 = arith.constant 0 : index
    %c0_85 = arith.constant 0 : index
    %225 = vector.load %arg11[%c0_84, %c0_85] : memref<16x128xf32, #tpu.memory_space<vmem>>, vector<16x128xf32>
    tpu.vector_store %arg11[%c0_84, %c0_85], %224 {strides = array<i32>} : memref<16x128xf32, #tpu.memory_space<vmem>>, vector<16x128xf32>,
    %cst_86 = arith.constant 0.000000e+00 : f32
    %226 = vector.broadcast %cst_86 : f32 to vector<2x32xf32>
    %cst_87 = arith.constant 0.000000e+00 : f32
    %227 = vector.broadcast %cst_87 : f32 to vector<2x32xf32>
    %c0_i32_88 = arith.constant 0 : i32
    %c2_i32_89 = arith.constant 2 : i32
    %228 = arith.muli %c0_i32_88, %c2_i32_89 : i32
    %229 = arith.index_cast %228 : i32 to index
    %c0_90 = arith.constant 0 : index
    %230 = vector.load %arg11[%229, %c0_90] : memref<16x128xf32, #tpu.memory_space<vmem>>, vector<2x128xf32>
    %cst_91 = arith.constant dense<0.000000e+00> : vector<2x128xf32>
    %231 = tpu.matmul %226, %223, %cst_91 {dimension_numbers = #tpu.dot_dimension_numbers<[1], [0], [0], [1], [0, 0, 1, 1], [], []>} : vector<2x32xf32>, vector<32x128xf32>, vector<2x128xf32> -> vector<2x128xf32>
    %232 = arith.addf %230, %231 : vector<2x128xf32>
    %233 = arith.negf %232 : vector<2x128xf32>
    %234 = math.exp %233 : vector<2x128xf32>
    %cst_92 = arith.constant 1.000000e+00 : f32
    %235 = vector.broadcast %cst_92 : f32 to vector<2x128xf32>
    %236 = arith.addf %235, %234 : vector<2x128xf32>
    %237 = arith.divf %235, %236 : vector<2x128xf32>
    %238 = vector.extract_strided_slice %237 {offsets = [0, 0], sizes = [2, 32], strides = [1, 1]} : vector<2x128xf32> to vector<2x32xf32>
    %239 = vector.extract_strided_slice %237 {offsets = [0, 32], sizes = [2, 32], strides = [1, 1]} : vector<2x128xf32> to vector<2x32xf32>
    %240 = vector.extract_strided_slice %237 {offsets = [0, 64], sizes = [2, 32], strides = [1, 1]} : vector<2x128xf32> to vector<2x32xf32>
    %cst_93 = arith.constant 2.000000e+00 : f32
    %241 = vector.broadcast %cst_93 : f32 to vector<2x32xf32>
    %242 = arith.mulf %241, %240 : vector<2x32xf32>
    %cst_94 = arith.constant 1.000000e+00 : f32
    %243 = vector.broadcast %cst_94 : f32 to vector<2x32xf32>
    %244 = arith.subf %242, %243 : vector<2x32xf32>
    %245 = vector.extract_strided_slice %237 {offsets = [0, 96], sizes = [2, 32], strides = [1, 1]} : vector<2x128xf32> to vector<2x32xf32>
    %246 = arith.mulf %239, %227 : vector<2x32xf32>
    %247 = arith.mulf %238, %244 : vector<2x32xf32>
    %248 = arith.addf %246, %247 : vector<2x32xf32>
    %249 = math.tanh %248 : vector<2x32xf32>
    %250 = arith.mulf %245, %249 : vector<2x32xf32>
    %c2_i32_95 = arith.constant 2 : i32
    %251 = arith.muli %c0_i32_88, %c2_i32_95 : i32
    %252 = arith.index_cast %251 : i32 to index
    %c0_96 = arith.constant 0 : index
    %253 = vector.load %arg12[%252, %c0_96] : memref<16x32xf32, #tpu.memory_space<vmem>>, vector<2x32xf32>
    tpu.vector_store %arg12[%252, %c0_96], %250 {strides = array<i32>} : memref<16x32xf32, #tpu.memory_space<vmem>>, vector<2x32xf32>,
    %c1_i32_97 = arith.constant 1 : i32
    %c2_i32_98 = arith.constant 2 : i32
    %254 = arith.muli %c1_i32_97, %c2_i32_98 : i32
    %255 = arith.index_cast %254 : i32 to index
    %c0_99 = arith.constant 0 : index
    %256 = vector.load %arg11[%255, %c0_99] : memref<16x128xf32, #tpu.memory_space<vmem>>, vector<2x128xf32>
    %cst_100 = arith.constant dense<0.000000e+00> : vector<2x128xf32>
    %257 = tpu.matmul %250, %223, %cst_100 {dimension_numbers = #tpu.dot_dimension_numbers<[1], [0], [0], [1], [0, 0, 1, 1], [], []>} : vector<2x32xf32>, vector<32x128xf32>, vector<2x128xf32> -> vector<2x128xf32>
    %258 = arith.addf %256, %257 : vector<2x128xf32>
    %259 = arith.negf %258 : vector<2x128xf32>
    %260 = math.exp %259 : vector<2x128xf32>
    %cst_101 = arith.constant 1.000000e+00 : f32
    %261 = vector.broadcast %cst_101 : f32 to vector<2x128xf32>
    %262 = arith.addf %261, %260 : vector<2x128xf32>
    %263 = arith.divf %261, %262 : vector<2x128xf32>
    %264 = vector.extract_strided_slice %263 {offsets = [0, 0], sizes = [2, 32], strides = [1, 1]} : vector<2x128xf32> to vector<2x32xf32>
    %265 = vector.extract_strided_slice %263 {offsets = [0, 32], sizes = [2, 32], strides = [1, 1]} : vector<2x128xf32> to vector<2x32xf32>
    %266 = vector.extract_strided_slice %263 {offsets = [0, 64], sizes = [2, 32], strides = [1, 1]} : vector<2x128xf32> to vector<2x32xf32>
    %cst_102 = arith.constant 2.000000e+00 : f32
    %267 = vector.broadcast %cst_102 : f32 to vector<2x32xf32>
    %268 = arith.mulf %267, %266 : vector<2x32xf32>
    %cst_103 = arith.constant 1.000000e+00 : f32
    %269 = vector.broadcast %cst_103 : f32 to vector<2x32xf32>
    %270 = arith.subf %268, %269 : vector<2x32xf32>
    %271 = vector.extract_strided_slice %263 {offsets = [0, 96], sizes = [2, 32], strides = [1, 1]} : vector<2x128xf32> to vector<2x32xf32>
    %272 = arith.mulf %265, %248 : vector<2x32xf32>
    %273 = arith.mulf %264, %270 : vector<2x32xf32>
    %274 = arith.addf %272, %273 : vector<2x32xf32>
    %275 = math.tanh %274 : vector<2x32xf32>
    %276 = arith.mulf %271, %275 : vector<2x32xf32>
    %c2_i32_104 = arith.constant 2 : i32
    %277 = arith.muli %c1_i32_97, %c2_i32_104 : i32
    %278 = arith.index_cast %277 : i32 to index
    %c0_105 = arith.constant 0 : index
    %279 = vector.load %arg12[%278, %c0_105] : memref<16x32xf32, #tpu.memory_space<vmem>>, vector<2x32xf32>
    tpu.vector_store %arg12[%278, %c0_105], %276 {strides = array<i32>} : memref<16x32xf32, #tpu.memory_space<vmem>>, vector<2x32xf32>,
    %c2_i32_106 = arith.constant 2 : i32
    %c2_i32_107 = arith.constant 2 : i32
    %280 = arith.muli %c2_i32_106, %c2_i32_107 : i32
    %281 = arith.index_cast %280 : i32 to index
    %c0_108 = arith.constant 0 : index
    %282 = vector.load %arg11[%281, %c0_108] : memref<16x128xf32, #tpu.memory_space<vmem>>, vector<2x128xf32>
    %cst_109 = arith.constant dense<0.000000e+00> : vector<2x128xf32>
    %283 = tpu.matmul %276, %223, %cst_109 {dimension_numbers = #tpu.dot_dimension_numbers<[1], [0], [0], [1], [0, 0, 1, 1], [], []>} : vector<2x32xf32>, vector<32x128xf32>, vector<2x128xf32> -> vector<2x128xf32>
    %284 = arith.addf %282, %283 : vector<2x128xf32>
    %285 = arith.negf %284 : vector<2x128xf32>
    %286 = math.exp %285 : vector<2x128xf32>
    %cst_110 = arith.constant 1.000000e+00 : f32
    %287 = vector.broadcast %cst_110 : f32 to vector<2x128xf32>
    %288 = arith.addf %287, %286 : vector<2x128xf32>
    %289 = arith.divf %287, %288 : vector<2x128xf32>
    %290 = vector.extract_strided_slice %289 {offsets = [0, 0], sizes = [2, 32], strides = [1, 1]} : vector<2x128xf32> to vector<2x32xf32>
    %291 = vector.extract_strided_slice %289 {offsets = [0, 32], sizes = [2, 32], strides = [1, 1]} : vector<2x128xf32> to vector<2x32xf32>
    %292 = vector.extract_strided_slice %289 {offsets = [0, 64], sizes = [2, 32], strides = [1, 1]} : vector<2x128xf32> to vector<2x32xf32>
    %cst_111 = arith.constant 2.000000e+00 : f32
    %293 = vector.broadcast %cst_111 : f32 to vector<2x32xf32>
    %294 = arith.mulf %293, %292 : vector<2x32xf32>
    %cst_112 = arith.constant 1.000000e+00 : f32
    %295 = vector.broadcast %cst_112 : f32 to vector<2x32xf32>
    %296 = arith.subf %294, %295 : vector<2x32xf32>
    %297 = vector.extract_strided_slice %289 {offsets = [0, 96], sizes = [2, 32], strides = [1, 1]} : vector<2x128xf32> to vector<2x32xf32>
    %298 = arith.mulf %291, %274 : vector<2x32xf32>
    %299 = arith.mulf %290, %296 : vector<2x32xf32>
    %300 = arith.addf %298, %299 : vector<2x32xf32>
    %301 = math.tanh %300 : vector<2x32xf32>
    %302 = arith.mulf %297, %301 : vector<2x32xf32>
    %c2_i32_113 = arith.constant 2 : i32
    %303 = arith.muli %c2_i32_106, %c2_i32_113 : i32
    %304 = arith.index_cast %303 : i32 to index
    %c0_114 = arith.constant 0 : index
    %305 = vector.load %arg12[%304, %c0_114] : memref<16x32xf32, #tpu.memory_space<vmem>>, vector<2x32xf32>
    tpu.vector_store %arg12[%304, %c0_114], %302 {strides = array<i32>} : memref<16x32xf32, #tpu.memory_space<vmem>>, vector<2x32xf32>,
    %c3_i32_115 = arith.constant 3 : i32
    %c2_i32_116 = arith.constant 2 : i32
    %306 = arith.muli %c3_i32_115, %c2_i32_116 : i32
    %307 = arith.index_cast %306 : i32 to index
    %c0_117 = arith.constant 0 : index
    %308 = vector.load %arg11[%307, %c0_117] : memref<16x128xf32, #tpu.memory_space<vmem>>, vector<2x128xf32>
    %cst_118 = arith.constant dense<0.000000e+00> : vector<2x128xf32>
    %309 = tpu.matmul %302, %223, %cst_118 {dimension_numbers = #tpu.dot_dimension_numbers<[1], [0], [0], [1], [0, 0, 1, 1], [], []>} : vector<2x32xf32>, vector<32x128xf32>, vector<2x128xf32> -> vector<2x128xf32>
    %310 = arith.addf %308, %309 : vector<2x128xf32>
    %311 = arith.negf %310 : vector<2x128xf32>
    %312 = math.exp %311 : vector<2x128xf32>
    %cst_119 = arith.constant 1.000000e+00 : f32
    %313 = vector.broadcast %cst_119 : f32 to vector<2x128xf32>
    %314 = arith.addf %313, %312 : vector<2x128xf32>
    %315 = arith.divf %313, %314 : vector<2x128xf32>
    %316 = vector.extract_strided_slice %315 {offsets = [0, 0], sizes = [2, 32], strides = [1, 1]} : vector<2x128xf32> to vector<2x32xf32>
    %317 = vector.extract_strided_slice %315 {offsets = [0, 32], sizes = [2, 32], strides = [1, 1]} : vector<2x128xf32> to vector<2x32xf32>
    %318 = vector.extract_strided_slice %315 {offsets = [0, 64], sizes = [2, 32], strides = [1, 1]} : vector<2x128xf32> to vector<2x32xf32>
    %cst_120 = arith.constant 2.000000e+00 : f32
    %319 = vector.broadcast %cst_120 : f32 to vector<2x32xf32>
    %320 = arith.mulf %319, %318 : vector<2x32xf32>
    %cst_121 = arith.constant 1.000000e+00 : f32
    %321 = vector.broadcast %cst_121 : f32 to vector<2x32xf32>
    %322 = arith.subf %320, %321 : vector<2x32xf32>
    %323 = vector.extract_strided_slice %315 {offsets = [0, 96], sizes = [2, 32], strides = [1, 1]} : vector<2x128xf32> to vector<2x32xf32>
    %324 = arith.mulf %317, %300 : vector<2x32xf32>
    %325 = arith.mulf %316, %322 : vector<2x32xf32>
    %326 = arith.addf %324, %325 : vector<2x32xf32>
    %327 = math.tanh %326 : vector<2x32xf32>
    %328 = arith.mulf %323, %327 : vector<2x32xf32>
    %c2_i32_122 = arith.constant 2 : i32
    %329 = arith.muli %c3_i32_115, %c2_i32_122 : i32
    %330 = arith.index_cast %329 : i32 to index
    %c0_123 = arith.constant 0 : index
    %331 = vector.load %arg12[%330, %c0_123] : memref<16x32xf32, #tpu.memory_space<vmem>>, vector<2x32xf32>
    tpu.vector_store %arg12[%330, %c0_123], %328 {strides = array<i32>} : memref<16x32xf32, #tpu.memory_space<vmem>>, vector<2x32xf32>,
    %c4_i32_124 = arith.constant 4 : i32
    %c2_i32_125 = arith.constant 2 : i32
    %332 = arith.muli %c4_i32_124, %c2_i32_125 : i32
    %333 = arith.index_cast %332 : i32 to index
    %c0_126 = arith.constant 0 : index
    %334 = vector.load %arg11[%333, %c0_126] : memref<16x128xf32, #tpu.memory_space<vmem>>, vector<2x128xf32>
    %cst_127 = arith.constant dense<0.000000e+00> : vector<2x128xf32>
    %335 = tpu.matmul %328, %223, %cst_127 {dimension_numbers = #tpu.dot_dimension_numbers<[1], [0], [0], [1], [0, 0, 1, 1], [], []>} : vector<2x32xf32>, vector<32x128xf32>, vector<2x128xf32> -> vector<2x128xf32>
    %336 = arith.addf %334, %335 : vector<2x128xf32>
    %337 = arith.negf %336 : vector<2x128xf32>
    %338 = math.exp %337 : vector<2x128xf32>
    %cst_128 = arith.constant 1.000000e+00 : f32
    %339 = vector.broadcast %cst_128 : f32 to vector<2x128xf32>
    %340 = arith.addf %339, %338 : vector<2x128xf32>
    %341 = arith.divf %339, %340 : vector<2x128xf32>
    %342 = vector.extract_strided_slice %341 {offsets = [0, 0], sizes = [2, 32], strides = [1, 1]} : vector<2x128xf32> to vector<2x32xf32>
    %343 = vector.extract_strided_slice %341 {offsets = [0, 32], sizes = [2, 32], strides = [1, 1]} : vector<2x128xf32> to vector<2x32xf32>
    %344 = vector.extract_strided_slice %341 {offsets = [0, 64], sizes = [2, 32], strides = [1, 1]} : vector<2x128xf32> to vector<2x32xf32>
    %cst_129 = arith.constant 2.000000e+00 : f32
    %345 = vector.broadcast %cst_129 : f32 to vector<2x32xf32>
    %346 = arith.mulf %345, %344 : vector<2x32xf32>
    %cst_130 = arith.constant 1.000000e+00 : f32
    %347 = vector.broadcast %cst_130 : f32 to vector<2x32xf32>
    %348 = arith.subf %346, %347 : vector<2x32xf32>
    %349 = vector.extract_strided_slice %341 {offsets = [0, 96], sizes = [2, 32], strides = [1, 1]} : vector<2x128xf32> to vector<2x32xf32>
    %350 = arith.mulf %343, %326 : vector<2x32xf32>
    %351 = arith.mulf %342, %348 : vector<2x32xf32>
    %352 = arith.addf %350, %351 : vector<2x32xf32>
    %353 = math.tanh %352 : vector<2x32xf32>
    %354 = arith.mulf %349, %353 : vector<2x32xf32>
    %c2_i32_131 = arith.constant 2 : i32
    %355 = arith.muli %c4_i32_124, %c2_i32_131 : i32
    %356 = arith.index_cast %355 : i32 to index
    %c0_132 = arith.constant 0 : index
    %357 = vector.load %arg12[%356, %c0_132] : memref<16x32xf32, #tpu.memory_space<vmem>>, vector<2x32xf32>
    tpu.vector_store %arg12[%356, %c0_132], %354 {strides = array<i32>} : memref<16x32xf32, #tpu.memory_space<vmem>>, vector<2x32xf32>,
    %c5_i32_133 = arith.constant 5 : i32
    %c2_i32_134 = arith.constant 2 : i32
    %358 = arith.muli %c5_i32_133, %c2_i32_134 : i32
    %359 = arith.index_cast %358 : i32 to index
    %c0_135 = arith.constant 0 : index
    %360 = vector.load %arg11[%359, %c0_135] : memref<16x128xf32, #tpu.memory_space<vmem>>, vector<2x128xf32>
    %cst_136 = arith.constant dense<0.000000e+00> : vector<2x128xf32>
    %361 = tpu.matmul %354, %223, %cst_136 {dimension_numbers = #tpu.dot_dimension_numbers<[1], [0], [0], [1], [0, 0, 1, 1], [], []>} : vector<2x32xf32>, vector<32x128xf32>, vector<2x128xf32> -> vector<2x128xf32>
    %362 = arith.addf %360, %361 : vector<2x128xf32>
    %363 = arith.negf %362 : vector<2x128xf32>
    %364 = math.exp %363 : vector<2x128xf32>
    %cst_137 = arith.constant 1.000000e+00 : f32
    %365 = vector.broadcast %cst_137 : f32 to vector<2x128xf32>
    %366 = arith.addf %365, %364 : vector<2x128xf32>
    %367 = arith.divf %365, %366 : vector<2x128xf32>
    %368 = vector.extract_strided_slice %367 {offsets = [0, 0], sizes = [2, 32], strides = [1, 1]} : vector<2x128xf32> to vector<2x32xf32>
    %369 = vector.extract_strided_slice %367 {offsets = [0, 32], sizes = [2, 32], strides = [1, 1]} : vector<2x128xf32> to vector<2x32xf32>
    %370 = vector.extract_strided_slice %367 {offsets = [0, 64], sizes = [2, 32], strides = [1, 1]} : vector<2x128xf32> to vector<2x32xf32>
    %cst_138 = arith.constant 2.000000e+00 : f32
    %371 = vector.broadcast %cst_138 : f32 to vector<2x32xf32>
    %372 = arith.mulf %371, %370 : vector<2x32xf32>
    %cst_139 = arith.constant 1.000000e+00 : f32
    %373 = vector.broadcast %cst_139 : f32 to vector<2x32xf32>
    %374 = arith.subf %372, %373 : vector<2x32xf32>
    %375 = vector.extract_strided_slice %367 {offsets = [0, 96], sizes = [2, 32], strides = [1, 1]} : vector<2x128xf32> to vector<2x32xf32>
    %376 = arith.mulf %369, %352 : vector<2x32xf32>
    %377 = arith.mulf %368, %374 : vector<2x32xf32>
    %378 = arith.addf %376, %377 : vector<2x32xf32>
    %379 = math.tanh %378 : vector<2x32xf32>
    %380 = arith.mulf %375, %379 : vector<2x32xf32>
    %c2_i32_140 = arith.constant 2 : i32
    %381 = arith.muli %c5_i32_133, %c2_i32_140 : i32
    %382 = arith.index_cast %381 : i32 to index
    %c0_141 = arith.constant 0 : index
    %383 = vector.load %arg12[%382, %c0_141] : memref<16x32xf32, #tpu.memory_space<vmem>>, vector<2x32xf32>
    tpu.vector_store %arg12[%382, %c0_141], %380 {strides = array<i32>} : memref<16x32xf32, #tpu.memory_space<vmem>>, vector<2x32xf32>,
    %c6_i32_142 = arith.constant 6 : i32
    %c2_i32_143 = arith.constant 2 : i32
    %384 = arith.muli %c6_i32_142, %c2_i32_143 : i32
    %385 = arith.index_cast %384 : i32 to index
    %c0_144 = arith.constant 0 : index
    %386 = vector.load %arg11[%385, %c0_144] : memref<16x128xf32, #tpu.memory_space<vmem>>, vector<2x128xf32>
    %cst_145 = arith.constant dense<0.000000e+00> : vector<2x128xf32>
    %387 = tpu.matmul %380, %223, %cst_145 {dimension_numbers = #tpu.dot_dimension_numbers<[1], [0], [0], [1], [0, 0, 1, 1], [], []>} : vector<2x32xf32>, vector<32x128xf32>, vector<2x128xf32> -> vector<2x128xf32>
    %388 = arith.addf %386, %387 : vector<2x128xf32>
    %389 = arith.negf %388 : vector<2x128xf32>
    %390 = math.exp %389 : vector<2x128xf32>
    %cst_146 = arith.constant 1.000000e+00 : f32
    %391 = vector.broadcast %cst_146 : f32 to vector<2x128xf32>
    %392 = arith.addf %391, %390 : vector<2x128xf32>
    %393 = arith.divf %391, %392 : vector<2x128xf32>
    %394 = vector.extract_strided_slice %393 {offsets = [0, 0], sizes = [2, 32], strides = [1, 1]} : vector<2x128xf32> to vector<2x32xf32>
    %395 = vector.extract_strided_slice %393 {offsets = [0, 32], sizes = [2, 32], strides = [1, 1]} : vector<2x128xf32> to vector<2x32xf32>
    %396 = vector.extract_strided_slice %393 {offsets = [0, 64], sizes = [2, 32], strides = [1, 1]} : vector<2x128xf32> to vector<2x32xf32>
    %cst_147 = arith.constant 2.000000e+00 : f32
    %397 = vector.broadcast %cst_147 : f32 to vector<2x32xf32>
    %398 = arith.mulf %397, %396 : vector<2x32xf32>
    %cst_148 = arith.constant 1.000000e+00 : f32
    %399 = vector.broadcast %cst_148 : f32 to vector<2x32xf32>
    %400 = arith.subf %398, %399 : vector<2x32xf32>
    %401 = vector.extract_strided_slice %393 {offsets = [0, 96], sizes = [2, 32], strides = [1, 1]} : vector<2x128xf32> to vector<2x32xf32>
    %402 = arith.mulf %395, %378 : vector<2x32xf32>
    %403 = arith.mulf %394, %400 : vector<2x32xf32>
    %404 = arith.addf %402, %403 : vector<2x32xf32>
    %405 = math.tanh %404 : vector<2x32xf32>
    %406 = arith.mulf %401, %405 : vector<2x32xf32>
    %c2_i32_149 = arith.constant 2 : i32
    %407 = arith.muli %c6_i32_142, %c2_i32_149 : i32
    %408 = arith.index_cast %407 : i32 to index
    %c0_150 = arith.constant 0 : index
    %409 = vector.load %arg12[%408, %c0_150] : memref<16x32xf32, #tpu.memory_space<vmem>>, vector<2x32xf32>
    tpu.vector_store %arg12[%408, %c0_150], %406 {strides = array<i32>} : memref<16x32xf32, #tpu.memory_space<vmem>>, vector<2x32xf32>,
    %c7_i32_151 = arith.constant 7 : i32
    %c2_i32_152 = arith.constant 2 : i32
    %410 = arith.muli %c7_i32_151, %c2_i32_152 : i32
    %411 = arith.index_cast %410 : i32 to index
    %c0_153 = arith.constant 0 : index
    %412 = vector.load %arg11[%411, %c0_153] : memref<16x128xf32, #tpu.memory_space<vmem>>, vector<2x128xf32>
    %cst_154 = arith.constant dense<0.000000e+00> : vector<2x128xf32>
    %413 = tpu.matmul %406, %223, %cst_154 {dimension_numbers = #tpu.dot_dimension_numbers<[1], [0], [0], [1], [0, 0, 1, 1], [], []>} : vector<2x32xf32>, vector<32x128xf32>, vector<2x128xf32> -> vector<2x128xf32>
    %414 = arith.addf %412, %413 : vector<2x128xf32>
    %415 = arith.negf %414 : vector<2x128xf32>
    %416 = math.exp %415 : vector<2x128xf32>
    %cst_155 = arith.constant 1.000000e+00 : f32
    %417 = vector.broadcast %cst_155 : f32 to vector<2x128xf32>
    %418 = arith.addf %417, %416 : vector<2x128xf32>
    %419 = arith.divf %417, %418 : vector<2x128xf32>
    %420 = vector.extract_strided_slice %419 {offsets = [0, 0], sizes = [2, 32], strides = [1, 1]} : vector<2x128xf32> to vector<2x32xf32>
    %421 = vector.extract_strided_slice %419 {offsets = [0, 32], sizes = [2, 32], strides = [1, 1]} : vector<2x128xf32> to vector<2x32xf32>
    %422 = vector.extract_strided_slice %419 {offsets = [0, 64], sizes = [2, 32], strides = [1, 1]} : vector<2x128xf32> to vector<2x32xf32>
    %cst_156 = arith.constant 2.000000e+00 : f32
    %423 = vector.broadcast %cst_156 : f32 to vector<2x32xf32>
    %424 = arith.mulf %423, %422 : vector<2x32xf32>
    %cst_157 = arith.constant 1.000000e+00 : f32
    %425 = vector.broadcast %cst_157 : f32 to vector<2x32xf32>
    %426 = arith.subf %424, %425 : vector<2x32xf32>
    %427 = vector.extract_strided_slice %419 {offsets = [0, 96], sizes = [2, 32], strides = [1, 1]} : vector<2x128xf32> to vector<2x32xf32>
    %428 = arith.mulf %421, %404 : vector<2x32xf32>
    %429 = arith.mulf %420, %426 : vector<2x32xf32>
    %430 = arith.addf %428, %429 : vector<2x32xf32>
    %431 = math.tanh %430 : vector<2x32xf32>
    %432 = arith.mulf %427, %431 : vector<2x32xf32>
    %c2_i32_158 = arith.constant 2 : i32
    %433 = arith.muli %c7_i32_151, %c2_i32_158 : i32
    %434 = arith.index_cast %433 : i32 to index
    %c0_159 = arith.constant 0 : index
    %435 = vector.load %arg12[%434, %c0_159] : memref<16x32xf32, #tpu.memory_space<vmem>>, vector<2x32xf32>
    tpu.vector_store %arg12[%434, %c0_159], %432 {strides = array<i32>} : memref<16x32xf32, #tpu.memory_space<vmem>>, vector<2x32xf32>,
    %c8_i32_160 = arith.constant 8 : i32
    %c0_161 = arith.constant 0 : index
    %c0_162 = arith.constant 0 : index
    %436 = vector.load %arg12[%c0_161, %c0_162] : memref<16x32xf32, #tpu.memory_space<vmem>>, vector<16x32xf32>
    %c0_163 = arith.constant 0 : index
    %c0_164 = arith.constant 0 : index
    %437 = vector.load %arg7[%c0_163, %c0_164] : memref<1x32xf32, #tpu.memory_space<vmem>>, vector<1x32xf32>
    %438 = vector.broadcast %437 : vector<1x32xf32> to vector<16x32xf32>
    %439 = arith.mulf %436, %438 : vector<16x32xf32>
    %c0_165 = arith.constant 0 : index
    %c0_166 = arith.constant 0 : index
    %440 = vector.load %arg8[%c0_165, %c0_166] : memref<1x32xf32, #tpu.memory_space<vmem>>, vector<1x32xf32>
    %441 = vector.broadcast %440 : vector<1x32xf32> to vector<16x32xf32>
    %442 = arith.addf %439, %441 : vector<16x32xf32>
    %c0_167 = arith.constant 0 : index
    %c0_168 = arith.constant 0 : index
    %443 = vector.load %arg9[%c0_167, %c0_168] : memref<32x128xf32, #tpu.memory_space<vmem>>, vector<32x128xf32>
    %cst_169 = arith.constant dense<0.000000e+00> : vector<16x128xf32>
    %444 = tpu.matmul %442, %443, %cst_169 {dimension_numbers = #tpu.dot_dimension_numbers<[1], [0], [0], [1], [0, 0, 1, 1], [], []>} : vector<16x32xf32>, vector<32x128xf32>, vector<16x128xf32> -> vector<16x128xf32>
    %445 = tpu.iota {dimensions = array<i32: 1>} : vector<16x128xi32>
    %c39_i32 = arith.constant 39 : i32
    %446 = vector.broadcast %c39_i32 : i32 to vector<16x128xi32>
    %447 = arith.cmpi slt, %445, %446 : vector<16x128xi32>
    %cst_170 = arith.constant -1.000000e+30 : f32
    %448 = vector.broadcast %cst_170 : f32 to vector<16x128xf32>
    %449 = arith.select %447, %444, %448 : vector<16x128xi1>, vector<16x128xf32>
    %cst_171 = arith.constant dense<0xFF800000> : vector<16xf32>
    %450 = vector.multi_reduction <maximumf>, %449, %cst_171 [1] : vector<16x128xf32> to vector<16xf32>
    %451 = vector.shape_cast %450 : vector<16xf32> to vector<16x1xf32>
    %452 = vector.broadcast %451 : vector<16x1xf32> to vector<16x128xf32>
    %453 = arith.subf %449, %452 : vector<16x128xf32>
    %454 = math.exp %453 : vector<16x128xf32>
    %cst_172 = arith.constant dense<0.000000e+00> : vector<16xf32>
    %455 = vector.multi_reduction <add>, %454, %cst_172 [1] : vector<16x128xf32> to vector<16xf32>
    %456 = vector.shape_cast %455 : vector<16xf32> to vector<16x1xf32>
    %457 = math.log %456 : vector<16x1xf32>
    %458 = arith.addf %451, %457 : vector<16x1xf32>
    %459 = vector.broadcast %458 : vector<16x1xf32> to vector<16x128xf32>
    %460 = arith.subf %444, %459 : vector<16x128xf32>
    %c0_173 = arith.constant 0 : index
    %c0_174 = arith.constant 0 : index
    %461 = vector.load %arg10[%c0_173, %c0_174] : memref<16x128xf32, #tpu.memory_space<vmem>>, vector<16x128xf32>
    tpu.vector_store %arg10[%c0_173, %c0_174], %460 {strides = array<i32>} : memref<16x128xf32, #tpu.memory_space<vmem>>, vector<16x128xf32>,
    return
  }
}

</mosaic_0001>

<bundles_post_ra>
// kernel: tpu_custom_call.1
= control target key start
LH: loop header
LB: loop body
LE: loop exit
PB: predicated region body
PF: predicated region fallthrough
CT: control target
= control target key end

     0   :  { %15 = vsyncpa [#allocation5], 0  ;;  %s3383_s0 = inlined_call_operand.hbm [shape: f32[16,32], index: 0, kind: input, shape index: {}]   ;;  %s3384_s1 = inlined_call_operand.hbm [shape: f32[32,128], index: 1, kind: input, shape index: {}]   ;;  %s3385_s2 = inlined_call_operand.hbm [shape: f32[32,128], index: 2, kind: input, shape index: {}]   ;;  %s3386_s3 = inlined_call_operand.vmem [shape: f32[1,32], index: 3, kind: input, shape index: {}]   ;;  %s3387_s4 = inlined_call_operand.vmem [shape: f32[1,32], index: 4, kind: input, shape index: {}]   ;;  %s3388_s5 = inlined_call_operand.hbm [shape: f32[32,128], index: 5, kind: input, shape index: {}]   ;;  %s3389_s6 = inlined_call_operand.hbm [shape: f32[32,128], index: 6, kind: input, shape index: {}]   ;;  %s3390_s7 = inlined_call_operand.hbm [shape: f32[1,32], index: 7, kind: input, shape index: {}]   ;;  %s3391_s8 = inlined_call_operand.hbm [shape: f32[1,32], index: 8, kind: input, shape index: {}]   ;;  %s3392_s9 = inlined_call_operand.vmem [shape: f32[32,128], index: 9, kind: input, shape index: {}]   ;;  %s3393_s10 = inlined_call_operand.hbm [shape: f32[16,128], index: 10, kind: output, shape index: {}]  }
   0x1   :  { %16 = vsyncpa [#allocation8], 0 }
   0x2   :  { %17 = vsyncpa [#allocation11], 0 }
   0x3   :  { %18 = vsyncpa [#allocation14], 0 }
   0x4   :  { %19 = vsyncpa [#allocation6], 0  ;;  %s2938_s13 = smov [#allocation7]   ;;  %s2939_s15 = smov [#allocation10]  }
   0x5   :  { %s37_s14 = sshll.u32 %s2938_s13, 4  ;;  %s65_s16 = sshll.u32 %s2939_s15, 4  ;;  %s38_s14 = int_to_ptr.vmem [resolvable:$true] %s37_s14  ;;  %s3008_s16 = int_to_ptr.vmem [resolvable:$true] %s65_s16 }
   0x6   :  { %s2752_s19 = scalar_lea.hbm %s3384_s1, 512 }
   0x7   :  { %p2753_p0 = scmp.ne.s32.totalorder %s3384_s1, %s2752_s19  ;;  %p2756_p1 = scmp.lt.u32.totalorder %s2752_s19, %s3384_s1 }
   0x9   :  { %p2758_p2 = pnand %p2756_p1, %p2753_p0 }
   0xb   :  { %2761 = shalt.err (!%p2758_p2)
}
   0xc   :  { %s2762_s24 = scalar_lea.vmem %s38_s14, 512  ;;  %p2767_p4 = scmp.lt.s32.totalorder %s38_s14, %s38_s14 }
   0xd   :  { %p2763_p3 = scmp.ne.s32.totalorder %s38_s14, %s2762_s24  ;;  %p2768_p5 = scmp.lt.s32.totalorder %s2762_s24, %s2762_s24 }
   0xf   :  { %p2769_p6 = por %p2768_p5, %p2767_p4 }
  0x11   :  { %p2770_p7 = pnand %p2769_p6, %p2763_p3 }
  0x13   :  { %2773 = shalt.err (!%p2770_p7)
}
  0x14   :  { %s2940_s25 = smov 128   ;;  %s2941_s26 = smov 8  }
  0x15   :  { %43 = dma.hbm_to_vmem [thread:$0]  %s3384_s1, 512, %s38_s14, [#allocation8], %s2940_s25, %s2940_s25, %s2941_s26  }
  0x16   :  { %s2774_s11 = scalar_lea.hbm %s3388_s5, 512 }
  0x17   :  { %p2775_p8 = scmp.ne.s32.totalorder %s3388_s5, %s2774_s11  ;;  %p2778_p9 = scmp.lt.u32.totalorder %s2774_s11, %s3388_s5 }
  0x19   :  { %p2780_p10 = pnand %p2778_p9, %p2775_p8 }
  0x1b   :  { %2783 = shalt.err (!%p2780_p10)
}
  0x1c   :  { %s2784_s18 = scalar_lea.vmem %s3008_s16, 512  ;;  %p2789_p12 = scmp.lt.s32.totalorder %s3008_s16, %s3008_s16 }
  0x1d   :  { %p2785_p11 = scmp.ne.s32.totalorder %s3008_s16, %s2784_s18  ;;  %p2790_p13 = scmp.lt.s32.totalorder %s2784_s18, %s2784_s18 }
  0x1f   :  { %p2791_p0 = por %p2790_p13, %p2789_p12 }
  0x21   :  { %p2792_p1 = pnand %p2791_p0, %p2785_p11 }
  0x23   :  { %2795 = shalt.err (!%p2792_p1)
}
  0x24   :  { %71 = dma.hbm_to_vmem [thread:$0]  %s3388_s5, 512, %s3008_s16, [#allocation11], %s2940_s25, %s2940_s25, %s2941_s26  }
  0x25   :  { %s2942_s19 = smov [#allocation13]   ;;  %s2943_s21 = smov [#allocation4]  }
  0x26   :  { %s90_s20 = sshll.u32 %s2942_s19, 4  ;;  %s25_s22 = sshll.u32 %s2943_s21, 4  ;;  %s91_s20 = int_to_ptr.vmem [resolvable:$true] %s90_s20  ;;  %s3045_s22 = int_to_ptr.vmem [resolvable:$true] %s25_s22 }
  0x27   :  { %s2796_s27 = scalar_lea.hbm %s3390_s7, 16 }
  0x28   :  { %p2797_p2 = scmp.ne.s32.totalorder %s3390_s7, %s2796_s27  ;;  %p2800_p3 = scmp.lt.u32.totalorder %s2796_s27, %s3390_s7 }
  0x2a   :  { %p2802_p4 = pnand %p2800_p3, %p2797_p2 }
  0x2c   :  { %2805 = shalt.err (!%p2802_p4)
}
  0x2d   :  { %s2806_s5 = scalar_lea.vmem %s91_s20, 16  ;;  %s2810_s16 = scalar_lea.vmem %s91_s20, 32 }
  0x2e   :  { %p2807_p5 = scmp.ne.s32.totalorder %s91_s20, %s2806_s5  ;;  %p2811_p6 = scmp.lt.s32.totalorder %s91_s20, %s91_s20 }
  0x2f   :  { %p2812_p7 = scmp.lt.s32.totalorder %s2810_s16, %s2806_s5 }
  0x31   :  { %p2813_p8 = por %p2812_p7, %p2811_p6 }
  0x33   :  { %p2814_p9 = pnand %p2813_p8, %p2807_p5 }
  0x35   :  { %2817 = shalt.err (!%p2814_p9)
}
  0x36   :  { %93 = dma.hbm_to_vmem [thread:$0]  %s3390_s7, 16, %s91_s20, [#allocation14]  }
  0x37   :  { %s2818_s18 = scalar_lea.hbm %s3383_s0, 256 }
  0x38   :  { %p2819_p10 = scmp.ne.s32.totalorder %s3383_s0, %s2818_s18  ;;  %p2822_p11 = scmp.lt.u32.totalorder %s2818_s18, %s3383_s0 }
  0x3a   :  { %p2824_p12 = pnand %p2822_p11, %p2819_p10 }
  0x3c   :  { %2827 = shalt.err (!%p2824_p12)
}
  0x3d   :  { %s2828_s23 = scalar_lea.vmem %s3045_s22, 256  ;;  %p2833_p0 = scmp.lt.s32.totalorder %s3045_s22, %s3045_s22 }
  0x3e   :  { %p2829_p13 = scmp.ne.s32.totalorder %s3045_s22, %s2828_s23  ;;  %p2834_p1 = scmp.lt.s32.totalorder %s2828_s23, %s2828_s23 }
  0x40   :  { %p2835_p2 = por %p2834_p1, %p2833_p0 }
  0x42   :  { %p2836_p3 = pnand %p2835_p2, %p2829_p13 }
  0x44   :  { %2839 = shalt.err (!%p2836_p3)
}
  0x45   :  { %31 = dma.hbm_to_vmem [thread:$0]  %s3383_s0, 256, %s3045_s22, [#allocation5], %s2940_s25, %s2940_s25, %s2941_s26  }
  0x46   :  { %s2944_s24 = smov [#allocation9]   ;;  %s2945_s28 = smov [#allocation12]  }
  0x47   :  { %s49_s27 = sshll.u32 %s2944_s24, 4  ;;  %s77_s29 = sshll.u32 %s2945_s28, 4  ;;  %s50_s27 = int_to_ptr.vmem [resolvable:$true] %s49_s27  ;;  %s3079_s29 = int_to_ptr.vmem [resolvable:$true] %s77_s29 }
  0x48   :  { %s2840_s5 = scalar_lea.hbm %s3385_s2, 512 }
  0x49   :  { %p2841_p4 = scmp.ne.s32.totalorder %s3385_s2, %s2840_s5  ;;  %p2844_p5 = scmp.lt.u32.totalorder %s2840_s5, %s3385_s2 }
  0x4b   :  { %p2846_p6 = pnand %p2844_p5, %p2841_p4 }
  0x4d   :  { %2849 = shalt.err (!%p2846_p6)
}
  0x4e   :  { %s2850_s0 = scalar_lea.vmem %s50_s27, 512  ;;  %p2855_p8 = scmp.lt.s32.totalorder %s50_s27, %s50_s27 }
  0x4f   :  { %p2851_p7 = scmp.ne.s32.totalorder %s50_s27, %s2850_s0  ;;  %p2856_p9 = scmp.lt.s32.totalorder %s2850_s0, %s2850_s0 }
  0x51   :  { %p2857_p10 = por %p2856_p9, %p2855_p8 }
  0x53   :  { %p2858_p11 = pnand %p2857_p10, %p2851_p7 }
  0x55   :  { %2861 = shalt.err (!%p2858_p11)
}
  0x56   :  { %55 = dma.hbm_to_vmem [thread:$0]  %s3385_s2, 512, %s50_s27, [#allocation8], %s2940_s25, %s2940_s25, %s2941_s26  }
  0x57   :  { %s2862_s14 = scalar_lea.hbm %s3389_s6, 512 }
  0x58   :  { %p2863_p12 = scmp.ne.s32.totalorder %s3389_s6, %s2862_s14  ;;  %p2866_p13 = scmp.lt.u32.totalorder %s2862_s14, %s3389_s6 }
  0x5a   :  { %p2868_p0 = pnand %p2866_p13, %p2863_p12 }
  0x5c   :  { %2871 = shalt.err (!%p2868_p0)
}
  0x5d   :  { %s2872_s20 = scalar_lea.vmem %s3079_s29, 512  ;;  %p2877_p2 = scmp.lt.s32.totalorder %s3079_s29, %s3079_s29 }
  0x5e   :  { %p2873_p1 = scmp.ne.s32.totalorder %s3079_s29, %s2872_s20  ;;  %p2878_p3 = scmp.lt.s32.totalorder %s2872_s20, %s2872_s20 }
  0x60   :  { %p2879_p4 = por %p2878_p3, %p2877_p2 }
  0x62   :  { %p2880_p5 = pnand %p2879_p4, %p2873_p1 }
  0x64   :  { %2883 = shalt.err (!%p2880_p5)
}
  0x65   :  { %83 = dma.hbm_to_vmem [thread:$0]  %s3389_s6, 512, %s3079_s29, [#allocation11], %s2940_s25, %s2940_s25, %s2941_s26  }
  0x66   :  { %s2946_s27 = smov [#allocation15]   ;;  %s2884_s5 = scalar_lea.hbm %s3391_s8, 16 }
  0x67   :  { %s100_s28 = sshll.u32 %s2946_s27, 4  ;;  %p2885_p6 = scmp.ne.s32.totalorder %s3391_s8, %s2884_s5  ;;  %s101_s28 = int_to_ptr.vmem [resolvable:$true] %s100_s28 }
  0x68   :  { %p2888_p7 = scmp.lt.u32.totalorder %s2884_s5, %s3391_s8 }
  0x6a   :  { %p2890_p8 = pnand %p2888_p7, %p2885_p6 }
  0x6c   :  { %2893 = shalt.err (!%p2890_p8)
}
  0x6d   :  { %s2894_s0 = scalar_lea.vmem %s101_s28, 16  ;;  %s2898_s6 = scalar_lea.vmem %s101_s28, 32 }
  0x6e   :  { %p2895_p9 = scmp.ne.s32.totalorder %s101_s28, %s2894_s0  ;;  %p2899_p10 = scmp.lt.s32.totalorder %s101_s28, %s101_s28 }
  0x6f   :  { %p2900_p11 = scmp.lt.s32.totalorder %s2898_s6, %s2894_s0 }
  0x71   :  { %p2901_p12 = por %p2900_p11, %p2899_p10 }
  0x73   :  { %p2902_p13 = pnand %p2901_p12, %p2895_p9 }
  0x75   :  { %2905 = shalt.err (!%p2902_p13)
}
  0x76   :  { %103 = dma.hbm_to_vmem [thread:$0]  %s3391_s8, 16, %s101_s28, [#allocation14]  }
  0x77   :  { %2928 = dma.done.wait [#allocation5], 256  }
  0x78   :  { %2929 = vsyncadd [#allocation5], 4294967040 }
  0x79   :  { %2930 = dma.done.wait [#allocation8], 1024  }
  0x7a   :  { %2931 = vsyncadd [#allocation8], 4294966272 }
  0x7b   :  { %2932 = dma.done.wait [#allocation11], 1024  }
  0x7c   :  { %2933 = vsyncadd [#allocation11], 4294966272 }
  0x7d   :  { %2934 = dma.done.wait [#allocation14], 32  }
  0x7e   :  { %2935 = vsyncadd [#allocation14], 4294967264  ;;  %v2947_v0 = vmov 0.0|0.0   ;;  %vm2948_vm0 = vmmov 0   ;;  %v2949_v1 = vmov 0.0   ;;  %vm137_vm1 = vcmask 261120  }
  0x7f   :  { %2521 = vmatprep.subr.bf16.mxu1 %v2947_v0  ;;  %2323 = vmatprep.mubr.msk.f32.mxu1 %vm2948_vm0, %v2949_v1  ;;  %v129_v2 = vld [vmem:[#allocation7] sm:$0xff]  ;;  %v130_v3 = vld [vmem:[#allocation7 + $0x8] sm:$0xff]  ;;  %v131_v4 = vld [vmem:[#allocation7 + $0x10] sm:$0xff]  ;;  %s2950_s8 = smov 64   ;;  %s2951_s17 = smov 32   ;;  %vm325_vm2 = vcmask 254976  }
  0x80   :  { %v2513_v5 = vpack.c.bf16 %v130_v3, %v129_v2  ;;  %v132_v6 = vld [vmem:[#allocation7 + $0x18] sm:$0xff]  ;;  %v127_v7 = vld [vmem:[#allocation4] sm:$0xff]  ;;  %v133_v9 = vld [vmem:[#allocation9] sm:$0xff] }
  0x81   :  { %v2517_v8 = vpack.c.bf16 %v132_v6, %v131_v4  ;;  %2312 = vmatprep.mubr.msk.f32.mxu0 %vm137_vm1, %v127_v7  ;;  %v134_v10 = vld [vmem:[#allocation9 + $0x8] sm:$0xff]  ;;  %v135_v11 = vld [vmem:[#allocation9 + $0x10] sm:$0xff]  ;;  %v136_v13 = vld [vmem:[#allocation9 + $0x18] sm:$0xff] }
  0x82   :  { %2514 = vmatprep.subr.bf16.mxu0 %v2513_v5  ;;  %v3132_v12 = vpack.c.bf16 %v134_v10, %v133_v9  ;;  %v3135_v14 = vpack.c.bf16 %v136_v13, %v135_v11  ;;  %v128_v15 = vld [vmem:[#allocation4 + $0x8] sm:$0xff] }
  0x83   :  { %2516 = vmatpush3.bf16.msra.mxu0 %v2513_v5 }
  0x84   :  { %2518 = vmatprep.subr.bf16.mxu0 %v2517_v8  ;;  %2523 = vmatpush3.bf16.msra.mxu1 %v3132_v12 }
  0x85   :  { %2524 = vmatprep.subr.bf16.mxu1 %v2947_v0 }
  0x87   :  { %2520 = vmatpush3.bf16.msra.mxu0 %v2517_v8 }
  0x88   :  { %2526 = vmatpush3.bf16.msra.mxu1 %v3135_v14  ;;  %2527 = vmatprep.subr.bf16.mxu0 %v2947_v0 }
  0x89   :  { %2533 = vmatprep.subr.bf16.mxu1 %v2947_v0 }
  0x8a   :  { %2313 = vmatmul.mubr.msk.f32.vlgmr.msra.gmra.mrb[0].mxu0 %vm137_vm1, %v128_v15 }
  0x8b   :  { %2324 = vmatmul.mubr.f32.vlgmr.msra.gmra.mrb[0].mxu1 %v2949_v1  ;;  %2529 = vmatpush3.bf16.msra.mxu0 %v3132_v12 }
  0x8c   :  { %2530 = vmatprep.subr.bf16.mxu0 %v2947_v0  ;;  %2334 = vmatprep.mubr.msk.f32.mxu0 %vm2948_vm0, %v2949_v1 }
  0x8d   :  { %2535 = vmatpush3.bf16.msra.mxu1 %v3132_v12  ;;  %2345 = vmatprep.mubr.msk.f32.mxu1 %vm2948_vm0, %v2949_v1 }
  0x8e   :  { %2536 = vmatprep.subr.bf16.mxu1 %v2947_v0 }
  0x8f   :  { %2532 = vmatpush3.bf16.msra.mxu0 %v3135_v14 }
  0x90   :  { %2539 = vmatprep.subr.bf16.mxu0 %v2947_v0 }
  0x91   :  { %2538 = vmatpush3.bf16.msra.mxu1 %v3135_v14 }
  0x92   :  { %2545 = vmatprep.subr.bf16.mxu1 %v2947_v0 }
 0x15d   :  { %v2314_v16 = vpop.f32.mrb[0].mxu0 }
 0x15e   :  { %220 = vst [vmem:[#allocation2 + $0x8] sm:$0xff] %v2314_v16  ;;  %v210_v17 = vpop.f32.mrb[1].mxu0  ;;  %v291_v18 = vpop.f32.mrb[0].mxu1 }
 0x15f   :  { %219 = vst [vmem:[#allocation2] sm:$0xff] %v210_v17  ;;  %v2325_v19 = vpop.f32.mrb[1].mxu1 }
 0x166   :  { %v221_v20 = vld [vmem:[#allocation2] sm:$0x3]  ;;  %v327_v37 = vld [vmem:[#allocation2 + $0x2] sm:$0x3]  ;;  %v431_v56 = vld [vmem:[#allocation2 + $0x4] sm:$0x3] }
 0x167   :  { %v295_v21 = vadd.f32 %v291_v18, %v221_v20  ;;  %v535_v15 = vld [vmem:[#allocation2 + $0x6] sm:$0x3] }
 0x169   :  { %v2152_v22 = vmul.f32 -1.442695, %v295_v21 }
 0x16b   :  { %2648 = vpow2.f32 %v2152_v22 }
 0x175   :  { %v2649_v23 = vpop.eup %2648 }
 0x176   :  { %v299_v24 = vadd.f32 1.0, %v2649_v23 }
 0x178   :  { %2650 = vrcp.f32 %v299_v24 }
 0x182   :  { %v2651_v25 = vpop.eup %2650 }
 0x183   :  { %v302_v26 = vmul.f32 2.0, %v2651_v25  ;;  %v304_v30 = vmul.f32 0.0, %v2651_v25 }
 0x185   :  { %v2153_v27 = vadd.f32 -1.0, %v302_v26 }
 0x187   :  { %306 = vrot.lane.b32.xlu0 %v2153_v27, %s2950_s8 }
 0x1f9   :  { %v307_v28 = vpop.permute.xlu0 %306 }
 0x1fa   :  { %v309_v29 = vmul.f32 %v2651_v25, %v307_v28 }
 0x1fc   :  { %311 = vrot.lane.b32.xlu0 %v309_v29, %s2951_s17 }
 0x26e   :  { %v312_v31 = vpop.permute.xlu0 %311 }
 0x26f   :  { %v314_v32 = vadd.f32 %v312_v31, %v304_v30 }
 0x271   :  { %2652 = vtanh.f32 %v314_v32 }
 0x27b   :  { %v2653_v33 = vpop.eup %2652 }
 0x27c   :  { %317 = vrot.lane.b32.xlu1 %v2653_v33, %s2950_s8 }
 0x2ee   :  { %v318_v34 = vpop.permute.xlu1 %317 }
 0x2ef   :  { %v320_v35 = vmul.f32 %v2651_v25, %v318_v34  ;;  %v639_v34 = vld [vmem:[#allocation2 + $0x8] sm:$0x3] }
 0x2f1   :  { %322 = vrot.lane.b32.xlu1 %v320_v35, %s2951_s17 }
 0x363   :  { %v323_v36 = vpop.permute.xlu1 %322 }
 0x364   :  { %326 = vst.msk [vmem:[#allocation3] sm:$0x3] %vm325_vm2, %v323_v36  ;;  %2335 = vmatmul.mubr.msk.f32.vlgmr.msra.gmra.mrb[2].mxu0 %vm137_vm1, %v323_v36 }
 0x365   :  { %2541 = vmatpush3.bf16.msra.mxu0 %v3132_v12  ;;  %2356 = vmatprep.mubr.msk.f32.mxu0 %vm2948_vm0, %v2949_v1 }
 0x366   :  { %2542 = vmatprep.subr.bf16.mxu0 %v2947_v0 }
 0x369   :  { %2544 = vmatpush3.bf16.msra.mxu0 %v3135_v14 }
 0x36a   :  { %2551 = vmatprep.subr.bf16.mxu0 %v2947_v0 }
 0x437   :  { %v396_v38 = vpop.f32.mrb[2].mxu0 }
 0x438   :  { %v400_v39 = vadd.f32 %v396_v38, %v327_v37  ;;  %v2336_v40 = vpop.f32.mrb[3].mxu0 }
 0x43a   :  { %v2155_v41 = vmul.f32 -1.442695, %v400_v39 }
 0x43c   :  { %2654 = vpow2.f32 %v2155_v41 }
 0x446   :  { %v2655_v42 = vpop.eup %2654 }
 0x447   :  { %v404_v43 = vadd.f32 1.0, %v2655_v42 }
 0x449   :  { %2656 = vrcp.f32 %v404_v43 }
 0x453   :  { %v2657_v44 = vpop.eup %2656 }
 0x454   :  { %v407_v45 = vmul.f32 2.0, %v2657_v44  ;;  %v409_v49 = vmul.f32 %v2657_v44, %v314_v32 }
 0x456   :  { %v2156_v46 = vadd.f32 -1.0, %v407_v45 }
 0x458   :  { %411 = vrot.lane.b32.xlu0 %v2156_v46, %s2950_s8 }
 0x4ca   :  { %v412_v47 = vpop.permute.xlu0 %411 }
 0x4cb   :  { %v414_v48 = vmul.f32 %v2657_v44, %v412_v47 }
 0x4cd   :  { %416 = vrot.lane.b32.xlu1 %v414_v48, %s2951_s17 }
 0x53f   :  { %v417_v50 = vpop.permute.xlu1 %416 }
 0x540   :  { %v419_v51 = vadd.f32 %v417_v50, %v409_v49 }
 0x542   :  { %2658 = vtanh.f32 %v419_v51 }
 0x54c   :  { %v2659_v52 = vpop.eup %2658 }
 0x54d   :  { %422 = vrot.lane.b32.xlu0 %v2659_v52, %s2950_s8 }
 0x5bf   :  { %v423_v53 = vpop.permute.xlu0 %422 }
 0x5c0   :  { %v425_v54 = vmul.f32 %v2657_v44, %v423_v53  ;;  %v743_v53 = vld [vmem:[#allocation2 + $0xa] sm:$0x3] }
 0x5c2   :  { %427 = vrot.lane.b32.xlu1 %v425_v54, %s2951_s17 }
 0x634   :  { %v428_v55 = vpop.permute.xlu1 %427 }
 0x635   :  { %430 = vst.msk [vmem:[#allocation3 + $0x2] sm:$0x3] %vm325_vm2, %v428_v55  ;;  %2346 = vmatmul.mubr.msk.f32.vlgmr.msra.gmra.mrb[2].mxu1 %vm137_vm1, %v428_v55 }
 0x636   :  { %2547 = vmatpush3.bf16.msra.mxu1 %v3132_v12  ;;  %2367 = vmatprep.mubr.msk.f32.mxu1 %vm2948_vm0, %v2949_v1 }
 0x637   :  { %2548 = vmatprep.subr.bf16.mxu1 %v2947_v0 }
 0x63a   :  { %2550 = vmatpush3.bf16.msra.mxu1 %v3135_v14 }
 0x63b   :  { %2557 = vmatprep.subr.bf16.mxu1 %v2947_v0 }
 0x708   :  { %v500_v57 = vpop.f32.mrb[2].mxu1 }
 0x709   :  { %v504_v58 = vadd.f32 %v500_v57, %v431_v56  ;;  %v2347_v59 = vpop.f32.mrb[3].mxu1 }
 0x70b   :  { %v2158_v60 = vmul.f32 -1.442695, %v504_v58 }
 0x70d   :  { %2660 = vpow2.f32 %v2158_v60 }
 0x717   :  { %v2661_v61 = vpop.eup %2660 }
 0x718   :  { %v508_v62 = vadd.f32 1.0, %v2661_v61 }
 0x71a   :  { %2662 = vrcp.f32 %v508_v62 }
 0x724   :  { %v2663_v63 = vpop.eup %2662 }
 0x725   :  { %v511_v2 = vmul.f32 2.0, %v2663_v63  ;;  %v513_v6 = vmul.f32 %v2663_v63, %v419_v51 }
 0x727   :  { %v2159_v3 = vadd.f32 -1.0, %v511_v2 }
 0x729   :  { %515 = vrot.lane.b32.xlu0 %v2159_v3, %s2950_s8 }
 0x79b   :  { %v516_v4 = vpop.permute.xlu0 %515 }
 0x79c   :  { %v518_v5 = vmul.f32 %v2663_v63, %v516_v4 }
 0x79e   :  { %520 = vrot.lane.b32.xlu1 %v518_v5, %s2951_s17 }
 0x810   :  { %v521_v7 = vpop.permute.xlu1 %520 }
 0x811   :  { %v523_v8 = vadd.f32 %v521_v7, %v513_v6 }
 0x813   :  { %2664 = vtanh.f32 %v523_v8 }
 0x81d   :  { %v2665_v9 = vpop.eup %2664 }
 0x81e   :  { %526 = vrot.lane.b32.xlu0 %v2665_v9, %s2950_s8 }
 0x890   :  { %v527_v10 = vpop.permute.xlu0 %526 }
 0x891   :  { %v529_v11 = vmul.f32 %v2663_v63, %v527_v10  ;;  %v3227_v10 = vld [vmem:[%s3387_s4] ss:$0 sm:$0xff] }
 0x893   :  { %531 = vrot.lane.b32.xlu1 %v529_v11, %s2951_s17 }
 0x905   :  { %v532_v13 = vpop.permute.xlu1 %531 }
 0x906   :  { %534 = vst.msk [vmem:[#allocation3 + $0x4] sm:$0x3] %vm325_vm2, %v532_v13  ;;  %2357 = vmatmul.mubr.msk.f32.vlgmr.msra.gmra.mrb[4].mxu0 %vm137_vm1, %v532_v13 }
 0x907   :  { %2553 = vmatpush3.bf16.msra.mxu0 %v3132_v12  ;;  %2378 = vmatprep.mubr.msk.f32.mxu0 %vm2948_vm0, %v2949_v1 }
 0x908   :  { %2554 = vmatprep.subr.bf16.mxu0 %v2947_v0 }
 0x90b   :  { %2556 = vmatpush3.bf16.msra.mxu0 %v3135_v14 }
 0x90c   :  { %2563 = vmatprep.subr.bf16.mxu0 %v2947_v0 }
 0x9d9   :  { %v604_v16 = vpop.f32.mrb[4].mxu0 }
 0x9da   :  { %v608_v17 = vadd.f32 %v604_v16, %v535_v15  ;;  %v2358_v18 = vpop.f32.mrb[5].mxu0  ;;  %v847_v15 = vld [vmem:[#allocation2 + $0xc] sm:$0x3] }
 0x9dc   :  { %v2161_v19 = vmul.f32 -1.442695, %v608_v17 }
 0x9de   :  { %2666 = vpow2.f32 %v2161_v19 }
 0x9e8   :  { %v2667_v20 = vpop.eup %2666 }
 0x9e9   :  { %v612_v21 = vadd.f32 1.0, %v2667_v20 }
 0x9eb   :  { %2668 = vrcp.f32 %v612_v21 }
 0x9f5   :  { %v2669_v22 = vpop.eup %2668 }
 0x9f6   :  { %v615_v23 = vmul.f32 2.0, %v2669_v22  ;;  %v617_v27 = vmul.f32 %v2669_v22, %v523_v8  ;;  %v3221_v8 = vld [vmem:[%s3386_s3] ss:$0 sm:$0xff] }
 0x9f8   :  { %v2162_v24 = vadd.f32 -1.0, %v615_v23 }
 0x9fa   :  { %619 = vrot.lane.b32.xlu0 %v2162_v24, %s2950_s8 }
 0xa6c   :  { %v620_v25 = vpop.permute.xlu0 %619 }
 0xa6d   :  { %v622_v26 = vmul.f32 %v2669_v22, %v620_v25 }
 0xa6f   :  { %624 = vrot.lane.b32.xlu1 %v622_v26, %s2951_s17 }
 0xae1   :  { %v625_v28 = vpop.permute.xlu1 %624 }
 0xae2   :  { %v627_v29 = vadd.f32 %v625_v28, %v617_v27 }
 0xae4   :  { %2670 = vtanh.f32 %v627_v29 }
 0xaee   :  { %v2671_v30 = vpop.eup %2670 }
 0xaef   :  { %630 = vrot.lane.b32.xlu0 %v2671_v30, %s2950_s8 }
 0xb61   :  { %v631_v31 = vpop.permute.xlu0 %630 }
 0xb62   :  { %v633_v32 = vmul.f32 %v2669_v22, %v631_v31 }
 0xb64   :  { %635 = vrot.lane.b32.xlu1 %v633_v32, %s2951_s17 }
 0xbd6   :  { %v636_v33 = vpop.permute.xlu1 %635 }
 0xbd7   :  { %638 = vst.msk [vmem:[#allocation3 + $0x6] sm:$0x3] %vm325_vm2, %v636_v33  ;;  %2368 = vmatmul.mubr.msk.f32.vlgmr.msra.gmra.mrb[4].mxu1 %vm137_vm1, %v636_v33 }
 0xbd8   :  { %2559 = vmatpush3.bf16.msra.mxu1 %v3132_v12  ;;  %2389 = vmatprep.mubr.msk.f32.mxu1 %vm2948_vm0, %v2949_v1 }
 0xbd9   :  { %2560 = vmatprep.subr.bf16.mxu1 %v2947_v0 }
 0xbdc   :  { %2562 = vmatpush3.bf16.msra.mxu1 %v3135_v14 }
 0xbde   :  { %v1055_v7 = vld [vmem:[#allocation3] sm:$0xff] }
 0xbdf   :  { %v1065_v9 = vmul.f32 %v3221_v8, %v1055_v7 }
 0xbe1   :  { %v1073_v13 = vadd.f32 %v3227_v10, %v1065_v9 }
 0xcaa   :  { %v708_v35 = vpop.f32.mrb[4].mxu1 }
 0xcab   :  { %v712_v36 = vadd.f32 %v708_v35, %v639_v34  ;;  %v2369_v37 = vpop.f32.mrb[5].mxu1  ;;  %v951_v34 = vld [vmem:[#allocation2 + $0xe] sm:$0x3] }
 0xcad   :  { %v2164_v38 = vmul.f32 -1.442695, %v712_v36 }
 0xcaf   :  { %2672 = vpow2.f32 %v2164_v38 }
 0xcb9   :  { %v2673_v39 = vpop.eup %2672 }
 0xcba   :  { %v716_v40 = vadd.f32 1.0, %v2673_v39 }
 0xcbc   :  { %2674 = vrcp.f32 %v716_v40 }
 0xcc6   :  { %v2675_v41 = vpop.eup %2674 }
 0xcc7   :  { %v719_v42 = vmul.f32 2.0, %v2675_v41  ;;  %v721_v46 = vmul.f32 %v2675_v41, %v627_v29 }
 0xcc9   :  { %v2165_v43 = vadd.f32 -1.0, %v719_v42 }
 0xccb   :  { %723 = vrot.lane.b32.xlu0 %v2165_v43, %s2950_s8 }
 0xd3d   :  { %v724_v44 = vpop.permute.xlu0 %723 }
 0xd3e   :  { %v726_v45 = vmul.f32 %v2675_v41, %v724_v44 }
 0xd40   :  { %728 = vrot.lane.b32.xlu1 %v726_v45, %s2951_s17 }
 0xdb2   :  { %v729_v47 = vpop.permute.xlu1 %728 }
 0xdb3   :  { %v731_v48 = vadd.f32 %v729_v47, %v721_v46 }
 0xdb5   :  { %2676 = vtanh.f32 %v731_v48 }
 0xdbf   :  { %v2677_v49 = vpop.eup %2676 }
 0xdc0   :  { %734 = vrot.lane.b32.xlu0 %v2677_v49, %s2950_s8 }
 0xe32   :  { %v735_v50 = vpop.permute.xlu0 %734 }
 0xe33   :  { %v737_v51 = vmul.f32 %v2675_v41, %v735_v50  ;;  %v1075_v50 = vld [vmem:[#allocation10] sm:$0xff] }
 0xe35   :  { %739 = vrot.lane.b32.xlu1 %v737_v51, %s2951_s17  ;;  %v1076_v51 = vld [vmem:[#allocation10 + $0x8] sm:$0xff] }
 0xea7   :  { %v740_v52 = vpop.permute.xlu1 %739 }
 0xea8   :  { %742 = vst.msk [vmem:[#allocation3 + $0x8] sm:$0x3] %vm325_vm2, %v740_v52  ;;  %2379 = vmatmul.mubr.msk.f32.vlgmr.msra.gmra.mrb[6].mxu0 %vm137_vm1, %v740_v52  ;;  %v1077_v52 = vld [vmem:[#allocation10 + $0x10] sm:$0xff] }
 0xea9   :  { %2565 = vmatpush3.bf16.msra.mxu0 %v3132_v12  ;;  %2400 = vmatprep.mubr.msk.f32.mxu0 %vm2948_vm0, %v2949_v1 }
 0xeaa   :  { %2566 = vmatprep.subr.bf16.mxu0 %v2947_v0 }
 0xead   :  { %2568 = vmatpush3.bf16.msra.mxu0 %v3135_v14 }
 0xeae   :  { %2577 = vmatprep.subr.bf16.mxu0 %v2947_v0 }
 0xf7b   :  { %v812_v54 = vpop.f32.mrb[6].mxu0 }
 0xf7c   :  { %v816_v55 = vadd.f32 %v812_v54, %v743_v53  ;;  %v2380_v56 = vpop.f32.mrb[7].mxu0  ;;  %v2569_v53 = vpack.c.bf16 %v1076_v51, %v1075_v50  ;;  %v1078_v54 = vld [vmem:[#allocation10 + $0x18] sm:$0xff] }
 0xf7e   :  { %v2167_v57 = vmul.f32 -1.442695, %v816_v55  ;;  %v2573_v55 = vpack.c.bf16 %v1078_v54, %v1077_v52  ;;  %2570 = vmatprep.subr.bf16.mxu1 %v2569_v53 }
 0xf80   :  { %2678 = vpow2.f32 %v2167_v57 }
 0xf8a   :  { %v2679_v58 = vpop.eup %2678 }
 0xf8b   :  { %v820_v59 = vadd.f32 1.0, %v2679_v58  ;;  %v1079_v58 = vld [vmem:[#allocation12] sm:$0xff] }
 0xf8d   :  { %2680 = vrcp.f32 %v820_v59  ;;  %v1080_v59 = vld [vmem:[#allocation12 + $0x8] sm:$0xff] }
 0xf97   :  { %v2681_v60 = vpop.eup %2680 }
 0xf98   :  { %v823_v12 = vmul.f32 2.0, %v2681_v60  ;;  %v825_v14 = vmul.f32 %v2681_v60, %v731_v48 }
 0xf9a   :  { %v2168_v61 = vadd.f32 -1.0, %v823_v12  ;;  %v3246_v12 = vpack.c.bf16 %v1080_v59, %v1079_v58 }
 0xf9c   :  { %827 = vrot.lane.b32.xlu0 %v2168_v61, %s2950_s8  ;;  %v1082_v61 = vld [vmem:[#allocation12 + $0x18] sm:$0xff] }
0x100e   :  { %v828_v62 = vpop.permute.xlu0 %827 }
0x100f   :  { %v830_v63 = vmul.f32 %v2681_v60, %v828_v62 }
0x1011   :  { %832 = vrot.lane.b32.xlu1 %v830_v63, %s2951_s17 }
0x1083   :  { %v833_v2 = vpop.permute.xlu1 %832 }
0x1084   :  { %v835_v3 = vadd.f32 %v833_v2, %v825_v14 }
0x1086   :  { %2682 = vtanh.f32 %v835_v3 }
0x1090   :  { %v2683_v4 = vpop.eup %2682 }
0x1091   :  { %838 = vrot.lane.b32.xlu0 %v2683_v4, %s2950_s8 }
0x1103   :  { %v839_v5 = vpop.permute.xlu0 %838 }
0x1104   :  { %v841_v6 = vmul.f32 %v2681_v60, %v839_v5  ;;  %v1081_v60 = vld [vmem:[#allocation12 + $0x10] sm:$0xff] }
0x1105   :  { %v3249_v62 = vpack.c.bf16 %v1082_v61, %v1081_v60 }
0x1106   :  { %843 = vrot.lane.b32.xlu1 %v841_v6, %s2951_s17 }
0x1178   :  { %v844_v11 = vpop.permute.xlu1 %843 }
0x1179   :  { %846 = vst.msk [vmem:[#allocation3 + $0xa] sm:$0x3] %vm325_vm2, %v844_v11  ;;  %2390 = vmatmul.mubr.msk.f32.vlgmr.msra.gmra.mrb[6].mxu1 %vm137_vm1, %v844_v11 }
0x117a   :  { %2411 = vmatprep.mubr.msk.f32.mxu1 %vm137_vm1, %v1073_v13  ;;  %2572 = vmatpush3.bf16.msra.mxu1 %v2569_v53 }
0x117b   :  { %2574 = vmatprep.subr.bf16.mxu1 %v2573_v55 }
0x117e   :  { %2576 = vmatpush3.bf16.msra.mxu1 %v2573_v55 }
0x117f   :  { %2583 = vmatprep.subr.bf16.mxu1 %v2947_v0 }
0x124c   :  { %v916_v16 = vpop.f32.mrb[6].mxu1 }
0x124d   :  { %v920_v17 = vadd.f32 %v916_v16, %v847_v15  ;;  %v2391_v18 = vpop.f32.mrb[7].mxu1 }
0x124f   :  { %v2170_v19 = vmul.f32 -1.442695, %v920_v17 }
0x1251   :  { %2684 = vpow2.f32 %v2170_v19 }
0x125b   :  { %v2685_v20 = vpop.eup %2684 }
0x125c   :  { %v924_v21 = vadd.f32 1.0, %v2685_v20 }
0x125e   :  { %2686 = vrcp.f32 %v924_v21 }
0x1268   :  { %v2687_v22 = vpop.eup %2686 }
0x1269   :  { %v927_v23 = vmul.f32 2.0, %v2687_v22  ;;  %v929_v27 = vmul.f32 %v2687_v22, %v835_v3 }
0x126b   :  { %v2171_v24 = vadd.f32 -1.0, %v927_v23 }
0x126d   :  { %931 = vrot.lane.b32.xlu0 %v2171_v24, %s2950_s8 }
0x12df   :  { %v932_v25 = vpop.permute.xlu0 %931 }
0x12e0   :  { %v934_v26 = vmul.f32 %v2687_v22, %v932_v25 }
0x12e2   :  { %936 = vrot.lane.b32.xlu1 %v934_v26, %s2951_s17 }
0x1354   :  { %v937_v28 = vpop.permute.xlu1 %936 }
0x1355   :  { %v939_v29 = vadd.f32 %v937_v28, %v929_v27 }
0x1357   :  { %2688 = vtanh.f32 %v939_v29 }
0x1361   :  { %v2689_v30 = vpop.eup %2688 }
0x1362   :  { %942 = vrot.lane.b32.xlu0 %v2689_v30, %s2950_s8 }
0x13d4   :  { %v943_v31 = vpop.permute.xlu0 %942 }
0x13d5   :  { %v945_v32 = vmul.f32 %v2687_v22, %v943_v31 }
0x13d7   :  { %947 = vrot.lane.b32.xlu1 %v945_v32, %s2951_s17 }
0x1449   :  { %v948_v33 = vpop.permute.xlu1 %947 }
0x144a   :  { %950 = vst.msk [vmem:[#allocation3 + $0xc] sm:$0x3] %vm325_vm2, %v948_v33  ;;  %2401 = vmatmul.mubr.msk.f32.vlgmr.msra.gmra.mrb[8].mxu0 %vm137_vm1, %v948_v33 }
0x144b   :  { %2422 = vmatprep.mubr.msk.f32.mxu0 %vm2948_vm0, %v2949_v1  ;;  %2579 = vmatpush3.bf16.msra.mxu0 %v3246_v12 }
0x144c   :  { %2580 = vmatprep.subr.bf16.mxu0 %v2947_v0 }
0x144f   :  { %2582 = vmatpush3.bf16.msra.mxu0 %v3249_v62 }
0x1450   :  { %2589 = vmatprep.subr.bf16.mxu0 %v2947_v0 }
0x1452   :  { %2423 = vmatmul.mubr.f32.vlgmr.msra.gmra.mrb[10].mxu0 %v2949_v1 }
0x1453   :  { %2591 = vmatpush3.bf16.msra.mxu0 %v3246_v12  ;;  %2444 = vmatprep.mubr.msk.f32.mxu0 %vm2948_vm0, %v2949_v1 }
0x1454   :  { %2592 = vmatprep.subr.bf16.mxu0 %v2947_v0 }
0x1457   :  { %2594 = vmatpush3.bf16.msra.mxu0 %v3249_v62 }
0x1458   :  { %2601 = vmatprep.subr.bf16.mxu0 %v2947_v0 }
0x151d   :  { %v1020_v35 = vpop.f32.mrb[8].mxu0 }
0x151e   :  { %v1024_v36 = vadd.f32 %v1020_v35, %v951_v34  ;;  %v2402_v37 = vpop.f32.mrb[9].mxu0 }
0x1520   :  { %v2173_v38 = vmul.f32 -1.442695, %v1024_v36 }
0x1522   :  { %2690 = vpow2.f32 %v2173_v38 }
0x1525   :  { %v1233_v4 = vpop.f32.mrb[10].mxu0 }
0x1526   :  { %v2424_v5 = vpop.f32.mrb[11].mxu0 }
0x152c   :  { %v2691_v39 = vpop.eup %2690 }
0x152d   :  { %v1028_v40 = vadd.f32 1.0, %v2691_v39 }
0x152f   :  { %2692 = vrcp.f32 %v1028_v40 }
0x1539   :  { %v2693_v41 = vpop.eup %2692 }
0x153a   :  { %v1031_v42 = vmul.f32 2.0, %v2693_v41  ;;  %v1033_v46 = vmul.f32 %v2693_v41, %v939_v29 }
0x153c   :  { %v2174_v43 = vadd.f32 -1.0, %v1031_v42 }
0x153e   :  { %1035 = vrot.lane.b32.xlu0 %v2174_v43, %s2950_s8 }
0x15b0   :  { %v1036_v44 = vpop.permute.xlu0 %1035 }
0x15b1   :  { %v1038_v45 = vmul.f32 %v2693_v41, %v1036_v44 }
0x15b3   :  { %1040 = vrot.lane.b32.xlu1 %v1038_v45, %s2951_s17 }
0x1625   :  { %v1041_v47 = vpop.permute.xlu1 %1040 }
0x1626   :  { %v1043_v48 = vadd.f32 %v1041_v47, %v1033_v46 }
0x1628   :  { %2694 = vtanh.f32 %v1043_v48 }
0x1632   :  { %v2695_v49 = vpop.eup %2694 }
0x1633   :  { %1046 = vrot.lane.b32.xlu0 %v2695_v49, %s2950_s8 }
0x16a5   :  { %v1047_v56 = vpop.permute.xlu0 %1046 }
0x16a6   :  { %v1049_v57 = vmul.f32 %v2693_v41, %v1047_v56 }
0x16a8   :  { %1051 = vrot.lane.b32.xlu1 %v1049_v57, %s2951_s17 }
0x171a   :  { %v1052_v63 = vpop.permute.xlu1 %1051 }
0x171b   :  { %1054 = vst.msk [vmem:[#allocation3 + $0xe] sm:$0x3] %vm325_vm2, %v1052_v63 }
0x1722   :  { %v1056_v14 = vld [vmem:[#allocation3 + $0x8] sm:$0xff] }
0x1723   :  { %v1066_v2 = vmul.f32 %v3221_v8, %v1056_v14 }
0x1725   :  { %v1074_v3 = vadd.f32 %v3227_v10, %v1066_v2 }
0x1727   :  { %2412 = vmatmul.mubr.msk.f32.vlgmr.msra.gmra.mrb[8].mxu1 %vm137_vm1, %v1074_v3 }
0x1728   :  { %2585 = vmatpush3.bf16.msra.mxu1 %v3246_v12  ;;  %2433 = vmatprep.mubr.msk.f32.mxu1 %vm2948_vm0, %v2949_v1 }
0x1729   :  { %2586 = vmatprep.subr.bf16.mxu1 %v2947_v0 }
0x172c   :  { %2588 = vmatpush3.bf16.msra.mxu1 %v3249_v62 }
0x172d   :  { %2595 = vmatprep.subr.bf16.mxu1 %v2947_v0 }
0x17fa   :  { %v2413_v6 = vpop.f32.mrb[8].mxu1 }
0x17fb   :  { %1165 = vst [vmem:[#allocation2 + $0x8] sm:$0xff] %v2413_v6  ;;  %v1155_v7 = vpop.f32.mrb[9].mxu1 }
0x17fc   :  { %1164 = vst [vmem:[#allocation2] sm:$0xff] %v1155_v7 }
0x1803   :  { %v1166_v8 = vld [vmem:[#allocation2] sm:$0x3]  ;;  %v1268_v27 = vld [vmem:[#allocation2 + $0x2] sm:$0x3]  ;;  %v1372_v46 = vld [vmem:[#allocation2 + $0x4] sm:$0x3] }
0x1804   :  { %v1237_v9 = vadd.f32 %v1233_v4, %v1166_v8  ;;  %v1476_v3 = vld [vmem:[#allocation2 + $0x6] sm:$0x3] }
0x1806   :  { %v2179_v10 = vmul.f32 -1.442695, %v1237_v9 }
0x1808   :  { %2696 = vpow2.f32 %v2179_v10 }
0x1812   :  { %v2697_v11 = vpop.eup %2696 }
0x1813   :  { %v1241_v13 = vadd.f32 1.0, %v2697_v11 }
0x1815   :  { %2698 = vrcp.f32 %v1241_v13 }
0x181f   :  { %v2699_v15 = vpop.eup %2698 }
0x1820   :  { %v1244_v16 = vmul.f32 2.0, %v2699_v15  ;;  %v1246_v20 = vmul.f32 0.0, %v2699_v15 }
0x1822   :  { %v2180_v17 = vadd.f32 -1.0, %v1244_v16 }
0x1824   :  { %1248 = vrot.lane.b32.xlu0 %v2180_v17, %s2950_s8 }
0x1896   :  { %v1249_v18 = vpop.permute.xlu0 %1248 }
0x1897   :  { %v1251_v19 = vmul.f32 %v2699_v15, %v1249_v18 }
0x1899   :  { %1253 = vrot.lane.b32.xlu1 %v1251_v19, %s2951_s17 }
0x190b   :  { %v1254_v21 = vpop.permute.xlu1 %1253 }
0x190c   :  { %v1256_v22 = vadd.f32 %v1254_v21, %v1246_v20 }
0x190e   :  { %2700 = vtanh.f32 %v1256_v22 }
0x1918   :  { %v2701_v23 = vpop.eup %2700 }
0x1919   :  { %1259 = vrot.lane.b32.xlu0 %v2701_v23, %s2950_s8 }
0x198b   :  { %v1260_v24 = vpop.permute.xlu0 %1259 }
0x198c   :  { %v1262_v25 = vmul.f32 %v2699_v15, %v1260_v24  ;;  %v1580_v24 = vld [vmem:[#allocation2 + $0x8] sm:$0x3] }
0x198e   :  { %1264 = vrot.lane.b32.xlu1 %v1262_v25, %s2951_s17 }
0x1a00   :  { %v1265_v26 = vpop.permute.xlu1 %1264 }
0x1a01   :  { %1267 = vst.msk [vmem:[#allocation3] sm:$0x3] %vm325_vm2, %v1265_v26  ;;  %2434 = vmatmul.mubr.msk.f32.vlgmr.msra.gmra.mrb[10].mxu1 %vm137_vm1, %v1265_v26 }
0x1a02   :  { %2597 = vmatpush3.bf16.msra.mxu1 %v3246_v12  ;;  %2455 = vmatprep.mubr.msk.f32.mxu1 %vm2948_vm0, %v2949_v1 }
0x1a03   :  { %2598 = vmatprep.subr.bf16.mxu1 %v2947_v0 }
0x1a06   :  { %2600 = vmatpush3.bf16.msra.mxu1 %v3249_v62 }
0x1a07   :  { %2607 = vmatprep.subr.bf16.mxu1 %v2947_v0 }
0x1ad4   :  { %v1337_v28 = vpop.f32.mrb[10].mxu1 }
0x1ad5   :  { %v1341_v29 = vadd.f32 %v1337_v28, %v1268_v27  ;;  %v2435_v30 = vpop.f32.mrb[11].mxu1 }
0x1ad7   :  { %v2182_v31 = vmul.f32 -1.442695, %v1341_v29 }
0x1ad9   :  { %2702 = vpow2.f32 %v2182_v31 }
0x1ae3   :  { %v2703_v32 = vpop.eup %2702 }
0x1ae4   :  { %v1345_v33 = vadd.f32 1.0, %v2703_v32 }
0x1ae6   :  { %2704 = vrcp.f32 %v1345_v33 }
0x1af0   :  { %v2705_v34 = vpop.eup %2704 }
0x1af1   :  { %v1348_v35 = vmul.f32 2.0, %v2705_v34  ;;  %v1350_v39 = vmul.f32 %v2705_v34, %v1256_v22 }
0x1af3   :  { %v2183_v36 = vadd.f32 -1.0, %v1348_v35 }
0x1af5   :  { %1352 = vrot.lane.b32.xlu0 %v2183_v36, %s2950_s8 }
0x1b67   :  { %v1353_v37 = vpop.permute.xlu0 %1352 }
0x1b68   :  { %v1355_v38 = vmul.f32 %v2705_v34, %v1353_v37 }
0x1b6a   :  { %1357 = vrot.lane.b32.xlu1 %v1355_v38, %s2951_s17 }
0x1bdc   :  { %v1358_v40 = vpop.permute.xlu1 %1357 }
0x1bdd   :  { %v1360_v41 = vadd.f32 %v1358_v40, %v1350_v39 }
0x1bdf   :  { %2706 = vtanh.f32 %v1360_v41 }
0x1be9   :  { %v2707_v42 = vpop.eup %2706 }
0x1bea   :  { %1363 = vrot.lane.b32.xlu0 %v2707_v42, %s2950_s8 }
0x1c5c   :  { %v1364_v43 = vpop.permute.xlu0 %1363 }
0x1c5d   :  { %v1366_v44 = vmul.f32 %v2705_v34, %v1364_v43  ;;  %v1684_v43 = vld [vmem:[#allocation2 + $0xa] sm:$0x3] }
0x1c5f   :  { %1368 = vrot.lane.b32.xlu1 %v1366_v44, %s2951_s17 }
0x1cd1   :  { %v1369_v45 = vpop.permute.xlu1 %1368 }
0x1cd2   :  { %1371 = vst.msk [vmem:[#allocation3 + $0x2] sm:$0x3] %vm325_vm2, %v1369_v45  ;;  %2445 = vmatmul.mubr.msk.f32.vlgmr.msra.gmra.mrb[12].mxu0 %vm137_vm1, %v1369_v45 }
0x1cd3   :  { %2603 = vmatpush3.bf16.msra.mxu0 %v3246_v12  ;;  %2466 = vmatprep.mubr.msk.f32.mxu0 %vm2948_vm0, %v2949_v1 }
0x1cd4   :  { %2604 = vmatprep.subr.bf16.mxu0 %v2947_v0 }
0x1cd7   :  { %2606 = vmatpush3.bf16.msra.mxu0 %v3249_v62 }
0x1cd8   :  { %2613 = vmatprep.subr.bf16.mxu0 %v2947_v0 }
0x1da5   :  { %v1441_v47 = vpop.f32.mrb[12].mxu0 }
0x1da6   :  { %v1445_v48 = vadd.f32 %v1441_v47, %v1372_v46  ;;  %v2446_v49 = vpop.f32.mrb[13].mxu0 }
0x1da8   :  { %v2185_v50 = vmul.f32 -1.442695, %v1445_v48 }
0x1daa   :  { %2708 = vpow2.f32 %v2185_v50 }
0x1db4   :  { %v2709_v51 = vpop.eup %2708 }
0x1db5   :  { %v1449_v52 = vadd.f32 1.0, %v2709_v51 }
0x1db7   :  { %2710 = vrcp.f32 %v1449_v52 }
0x1dc1   :  { %v2711_v53 = vpop.eup %2710 }
0x1dc2   :  { %v1452_v54 = vmul.f32 2.0, %v2711_v53  ;;  %v1454_v58 = vmul.f32 %v2711_v53, %v1360_v41 }
0x1dc4   :  { %v2186_v55 = vadd.f32 -1.0, %v1452_v54 }
0x1dc6   :  { %1456 = vrot.lane.b32.xlu0 %v2186_v55, %s2950_s8 }
0x1e38   :  { %v1457_v56 = vpop.permute.xlu0 %1456 }
0x1e39   :  { %v1459_v57 = vmul.f32 %v2711_v53, %v1457_v56 }
0x1e3b   :  { %1461 = vrot.lane.b32.xlu1 %v1459_v57, %s2951_s17 }
0x1ead   :  { %v1462_v59 = vpop.permute.xlu1 %1461 }
0x1eae   :  { %v1464_v60 = vadd.f32 %v1462_v59, %v1454_v58  ;;  %v3333_v58 = vld [vmem:[#allocation13] ss:$0 sm:$0xff] }
0x1eb0   :  { %2712 = vtanh.f32 %v1464_v60 }
0x1eba   :  { %v2713_v61 = vpop.eup %2712 }
0x1ebb   :  { %1467 = vrot.lane.b32.xlu0 %v2713_v61, %s2950_s8 }
0x1f2d   :  { %v1468_v63 = vpop.permute.xlu0 %1467 }
0x1f2e   :  { %v1470_v14 = vmul.f32 %v2711_v53, %v1468_v63 }
0x1f30   :  { %1472 = vrot.lane.b32.xlu1 %v1470_v14, %s2951_s17  ;;  %v1788_v14 = vld [vmem:[#allocation2 + $0xc] sm:$0x3] }
0x1fa2   :  { %v1473_v2 = vpop.permute.xlu1 %1472 }
0x1fa3   :  { %1475 = vst.msk [vmem:[#allocation3 + $0x4] sm:$0x3] %vm325_vm2, %v1473_v2  ;;  %2456 = vmatmul.mubr.msk.f32.vlgmr.msra.gmra.mrb[12].mxu1 %vm137_vm1, %v1473_v2 }
0x1fa4   :  { %2609 = vmatpush3.bf16.msra.mxu1 %v3246_v12  ;;  %2477 = vmatprep.mubr.msk.f32.mxu1 %vm2948_vm0, %v2949_v1 }
0x1fa5   :  { %2610 = vmatprep.subr.bf16.mxu1 %v2947_v0 }
0x1fa8   :  { %2612 = vmatpush3.bf16.msra.mxu1 %v3249_v62 }
0x1fa9   :  { %2619 = vmatprep.subr.bf16.mxu1 %v2947_v0 }
0x2076   :  { %v1545_v4 = vpop.f32.mrb[12].mxu1 }
0x2077   :  { %v1549_v5 = vadd.f32 %v1545_v4, %v1476_v3  ;;  %v2457_v6 = vpop.f32.mrb[13].mxu1 }
0x2079   :  { %v2188_v7 = vmul.f32 -1.442695, %v1549_v5 }
0x207b   :  { %2714 = vpow2.f32 %v2188_v7 }
0x2085   :  { %v2715_v8 = vpop.eup %2714 }
0x2086   :  { %v1553_v9 = vadd.f32 1.0, %v2715_v8 }
0x2088   :  { %2716 = vrcp.f32 %v1553_v9 }
0x2092   :  { %v2717_v10 = vpop.eup %2716 }
0x2093   :  { %v1556_v11 = vmul.f32 2.0, %v2717_v10  ;;  %v1558_v17 = vmul.f32 %v2717_v10, %v1464_v60  ;;  %v3336_v60 = vld [vmem:[#allocation15] ss:$0 sm:$0xff] }
0x2095   :  { %v2189_v13 = vadd.f32 -1.0, %v1556_v11 }
0x2097   :  { %1560 = vrot.lane.b32.xlu0 %v2189_v13, %s2950_s8 }
0x2109   :  { %v1561_v15 = vpop.permute.xlu0 %1560 }
0x210a   :  { %v1563_v16 = vmul.f32 %v2717_v10, %v1561_v15 }
0x210c   :  { %1565 = vrot.lane.b32.xlu1 %v1563_v16, %s2951_s17 }
0x217e   :  { %v1566_v18 = vpop.permute.xlu1 %1565 }
0x217f   :  { %v1568_v19 = vadd.f32 %v1566_v18, %v1558_v17 }
0x2181   :  { %2718 = vtanh.f32 %v1568_v19 }
0x218b   :  { %v2719_v20 = vpop.eup %2718 }
0x218c   :  { %1571 = vrot.lane.b32.xlu0 %v2719_v20, %s2950_s8 }
0x21fe   :  { %v1572_v21 = vpop.permute.xlu0 %1571 }
0x21ff   :  { %v1574_v22 = vmul.f32 %v2717_v10, %v1572_v21 }
0x2201   :  { %1576 = vrot.lane.b32.xlu1 %v1574_v22, %s2951_s17  ;;  %v1892_v22 = vld [vmem:[#allocation2 + $0xe] sm:$0x3] }
0x2273   :  { %v1577_v23 = vpop.permute.xlu1 %1576 }
0x2274   :  { %1579 = vst.msk [vmem:[#allocation3 + $0x6] sm:$0x3] %vm325_vm2, %v1577_v23  ;;  %2467 = vmatmul.mubr.msk.f32.vlgmr.msra.gmra.mrb[14].mxu0 %vm137_vm1, %v1577_v23 }
0x2275   :  { %2615 = vmatpush3.bf16.msra.mxu0 %v3246_v12  ;;  %2488 = vmatprep.mubr.msk.f32.mxu0 %vm2948_vm0, %v2949_v1 }
0x2276   :  { %2616 = vmatprep.subr.bf16.mxu0 %v2947_v0 }
0x2279   :  { %2618 = vmatpush3.bf16.msra.mxu0 %v3249_v62 }
0x227b   :  { %v1996_v57 = vld [vmem:[#allocation3] sm:$0xff] }
0x227c   :  { %v2005_v59 = vmul.f32 %v3333_v58, %v1996_v57 }
0x227e   :  { %v2014_v63 = vadd.f32 %v3336_v60, %v2005_v59 }
0x2347   :  { %v1649_v25 = vpop.f32.mrb[14].mxu0 }
0x2348   :  { %v1653_v26 = vadd.f32 %v1649_v25, %v1580_v24  ;;  %v2468_v27 = vpop.f32.mrb[15].mxu0 }
0x234a   :  { %v2191_v28 = vmul.f32 -1.442695, %v1653_v26 }
0x234c   :  { %2720 = vpow2.f32 %v2191_v28 }
0x2356   :  { %v2721_v29 = vpop.eup %2720 }
0x2357   :  { %v1657_v30 = vadd.f32 1.0, %v2721_v29 }
0x2359   :  { %2722 = vrcp.f32 %v1657_v30 }
0x2363   :  { %v2723_v31 = vpop.eup %2722 }
0x2364   :  { %v1660_v32 = vmul.f32 2.0, %v2723_v31  ;;  %v1662_v36 = vmul.f32 %v2723_v31, %v1568_v19 }
0x2366   :  { %v2192_v33 = vadd.f32 -1.0, %v1660_v32 }
0x2368   :  { %1664 = vrot.lane.b32.xlu0 %v2192_v33, %s2950_s8 }
0x23da   :  { %v1665_v34 = vpop.permute.xlu0 %1664 }
0x23db   :  { %v1667_v35 = vmul.f32 %v2723_v31, %v1665_v34 }
0x23dd   :  { %1669 = vrot.lane.b32.xlu1 %v1667_v35, %s2951_s17 }
0x244f   :  { %v1670_v37 = vpop.permute.xlu1 %1669 }
0x2450   :  { %v1672_v38 = vadd.f32 %v1670_v37, %v1662_v36 }
0x2452   :  { %2724 = vtanh.f32 %v1672_v38 }
0x245c   :  { %v2725_v39 = vpop.eup %2724 }
0x245d   :  { %1675 = vrot.lane.b32.xlu0 %v2725_v39, %s2950_s8  ;;  %v2017_v39 = vld [vmem:[%s3392_s9 + $0x8] sm:$0xff] }
0x24cf   :  { %v1676_v40 = vpop.permute.xlu0 %1675 }
0x24d0   :  { %v1678_v41 = vmul.f32 %v2723_v31, %v1676_v40  ;;  %v2018_v40 = vld [vmem:[%s3392_s9 + $0x10] sm:$0xff] }
0x24d2   :  { %1680 = vrot.lane.b32.xlu1 %v1678_v41, %s2951_s17 }
0x2544   :  { %v1681_v42 = vpop.permute.xlu1 %1680 }
0x2545   :  { %1683 = vst.msk [vmem:[#allocation3 + $0x8] sm:$0x3] %vm325_vm2, %v1681_v42  ;;  %2478 = vmatmul.mubr.msk.f32.vlgmr.msra.gmra.mrb[14].mxu1 %vm137_vm1, %v1681_v42  ;;  %v2019_v42 = vld [vmem:[%s3392_s9 + $0x18] sm:$0xff] }
0x2546   :  { %2621 = vmatpush3.bf16.msra.mxu1 %v3246_v12  ;;  %2499 = vmatprep.mubr.msk.f32.mxu1 %vm2948_vm0, %v2949_v1 }
0x2547   :  { %2622 = vmatprep.subr.bf16.mxu1 %v2947_v0 }
0x254a   :  { %2624 = vmatpush3.bf16.msra.mxu1 %v3249_v62 }
0x2618   :  { %v1753_v44 = vpop.f32.mrb[14].mxu1 }
0x2619   :  { %v1757_v45 = vadd.f32 %v1753_v44, %v1684_v43  ;;  %v2479_v46 = vpop.f32.mrb[15].mxu1  ;;  %v2629_v43 = vpack.c.bf16 %v2019_v42, %v2018_v40 }
0x261b   :  { %v2194_v47 = vmul.f32 -1.442695, %v1757_v45 }
0x261d   :  { %2726 = vpow2.f32 %v2194_v47 }
0x2627   :  { %v2727_v48 = vpop.eup %2726 }
0x2628   :  { %v1761_v49 = vadd.f32 1.0, %v2727_v48 }
0x262a   :  { %2728 = vrcp.f32 %v1761_v49 }
0x2634   :  { %v2729_v50 = vpop.eup %2728 }
0x2635   :  { %v1764_v51 = vmul.f32 2.0, %v2729_v50  ;;  %v1766_v0 = vmul.f32 %v2729_v50, %v1672_v38  ;;  %v2016_v38 = vld [vmem:[%s3392_s9] sm:$0xff]  ;;  %s2952_s9 = smov [#allocation16]  }
0x2636   :  { %v2625_v41 = vpack.c.bf16 %v2017_v39, %v2016_v38  ;;  %s2135_s27 = sshll.u32 %s2952_s9, 4  ;;  %s2136_s27 = int_to_ptr.vmem [resolvable:$true] %s2135_s27 }
0x2637   :  { %v2195_v52 = vadd.f32 -1.0, %v1764_v51  ;;  %s2906_s28 = scalar_lea.vmem %s2136_s27, 256  ;;  %p2911_p1 = scmp.lt.s32.totalorder %s2136_s27, %s2136_s27 }
0x2638   :  { %2626 = vmatprep.subr.bf16.mxu0 %v2625_v41  ;;  %p2907_p0 = scmp.ne.s32.totalorder %s2136_s27, %s2906_s28  ;;  %p2912_p2 = scmp.lt.s32.totalorder %s2906_s28, %s2906_s28 }
0x2639   :  { %1768 = vrot.lane.b32.xlu0 %v2195_v52, %s2950_s8 }
0x263a   :  { %p2913_p3 = por %p2912_p2, %p2911_p1 }
0x263c   :  { %p2914_p4 = pnand %p2913_p3, %p2907_p0 }
0x26ab   :  { %v1769_v12 = vpop.permute.xlu0 %1768 }
0x26ac   :  { %v1771_v1 = vmul.f32 %v2729_v50, %v1769_v12 }
0x26ae   :  { %1773 = vrot.lane.b32.xlu1 %v1771_v1, %s2951_s17 }
0x2720   :  { %v1774_v62 = vpop.permute.xlu1 %1773 }
0x2721   :  { %v1776_v53 = vadd.f32 %v1774_v62, %v1766_v0 }
0x2723   :  { %2730 = vtanh.f32 %v1776_v53 }
0x272d   :  { %v2731_v54 = vpop.eup %2730 }
0x272e   :  { %1779 = vrot.lane.b32.xlu0 %v2731_v54, %s2950_s8 }
0x27a0   :  { %v1780_v55 = vpop.permute.xlu0 %1779 }
0x27a1   :  { %v1782_v56 = vmul.f32 %v2729_v50, %v1780_v55  ;;  %v2101_v50 = vlaneseq }
0x27a3   :  { %1784 = vrot.lane.b32.xlu1 %v1782_v56, %s2951_s17  ;;  %v2102_v51 = vand.u32 127, %v2101_v50 }
0x27a5   :  { %vm2103_vm3 = vcmp.lt.s32.totalorder %v2102_v51, 39 }
0x2815   :  { %v1785_v61 = vpop.permute.xlu1 %1784 }
0x2816   :  { %1787 = vst.msk [vmem:[#allocation3 + $0xa] sm:$0x3] %vm325_vm2, %v1785_v61  ;;  %2489 = vmatmul.mubr.msk.f32.vlgmr.msra.gmra.mrb[16].mxu0 %vm137_vm1, %v1785_v61 }
0x2817   :  { %2510 = vmatprep.mubr.msk.f32.mxu0 %vm137_vm1, %v2014_v63  ;;  %2628 = vmatpush3.bf16.msra.mxu0 %v2625_v41 }
0x2818   :  { %2630 = vmatprep.subr.bf16.mxu0 %v2629_v43 }
0x281b   :  { %2632 = vmatpush3.bf16.msra.mxu0 %v2629_v43 }
0x28e9   :  { %v1857_v2 = vpop.f32.mrb[16].mxu0 }
0x28ea   :  { %v1861_v3 = vadd.f32 %v1857_v2, %v1788_v14  ;;  %v2490_v4 = vpop.f32.mrb[17].mxu0 }
0x28ec   :  { %v2197_v5 = vmul.f32 -1.442695, %v1861_v3 }
0x28ee   :  { %2732 = vpow2.f32 %v2197_v5 }
0x28f8   :  { %v2733_v6 = vpop.eup %2732 }
0x28f9   :  { %v1865_v7 = vadd.f32 1.0, %v2733_v6 }
0x28fb   :  { %2734 = vrcp.f32 %v1865_v7 }
0x2905   :  { %v2735_v8 = vpop.eup %2734 }
0x2906   :  { %v1868_v9 = vmul.f32 2.0, %v2735_v8  ;;  %v1870_v15 = vmul.f32 %v2735_v8, %v1776_v53 }
0x2908   :  { %v2198_v10 = vadd.f32 -1.0, %v1868_v9 }
0x290a   :  { %1872 = vrot.lane.b32.xlu0 %v2198_v10, %s2950_s8 }
0x297c   :  { %v1873_v11 = vpop.permute.xlu0 %1872 }
0x297d   :  { %v1875_v13 = vmul.f32 %v2735_v8, %v1873_v11 }
0x297f   :  { %1877 = vrot.lane.b32.xlu1 %v1875_v13, %s2951_s17 }
0x29f1   :  { %v1878_v16 = vpop.permute.xlu1 %1877 }
0x29f2   :  { %v1880_v17 = vadd.f32 %v1878_v16, %v1870_v15 }
0x29f4   :  { %2736 = vtanh.f32 %v1880_v17 }
0x29fe   :  { %v2737_v18 = vpop.eup %2736 }
0x29ff   :  { %1883 = vrot.lane.b32.xlu0 %v2737_v18, %s2950_s8 }
0x2a71   :  { %v1884_v19 = vpop.permute.xlu0 %1883 }
0x2a72   :  { %v1886_v20 = vmul.f32 %v2735_v8, %v1884_v19 }
0x2a74   :  { %1888 = vrot.lane.b32.xlu1 %v1886_v20, %s2951_s17 }
0x2ae6   :  { %v1889_v21 = vpop.permute.xlu1 %1888 }
0x2ae7   :  { %1891 = vst.msk [vmem:[#allocation3 + $0xc] sm:$0x3] %vm325_vm2, %v1889_v21  ;;  %2500 = vmatmul.mubr.msk.f32.vlgmr.msra.gmra.mrb[16].mxu1 %vm137_vm1, %v1889_v21 }
0x2bba   :  { %v1961_v23 = vpop.f32.mrb[16].mxu1 }
0x2bbb   :  { %v1965_v24 = vadd.f32 %v1961_v23, %v1892_v22  ;;  %v2501_v25 = vpop.f32.mrb[17].mxu1 }
0x2bbd   :  { %v2200_v26 = vmul.f32 -1.442695, %v1965_v24 }
0x2bbf   :  { %2738 = vpow2.f32 %v2200_v26 }
0x2bc9   :  { %v2739_v27 = vpop.eup %2738 }
0x2bca   :  { %v1969_v28 = vadd.f32 1.0, %v2739_v27 }
0x2bcc   :  { %2740 = vrcp.f32 %v1969_v28 }
0x2bd6   :  { %v2741_v29 = vpop.eup %2740 }
0x2bd7   :  { %v1972_v30 = vmul.f32 2.0, %v2741_v29  ;;  %v1974_v34 = vmul.f32 %v2741_v29, %v1880_v17 }
0x2bd9   :  { %v2201_v31 = vadd.f32 -1.0, %v1972_v30 }
0x2bdb   :  { %1976 = vrot.lane.b32.xlu0 %v2201_v31, %s2950_s8 }
0x2c4d   :  { %v1977_v32 = vpop.permute.xlu0 %1976 }
0x2c4e   :  { %v1979_v33 = vmul.f32 %v2741_v29, %v1977_v32 }
0x2c50   :  { %1981 = vrot.lane.b32.xlu1 %v1979_v33, %s2951_s17 }
0x2cc2   :  { %v1982_v35 = vpop.permute.xlu1 %1981 }
0x2cc3   :  { %v1984_v36 = vadd.f32 %v1982_v35, %v1974_v34 }
0x2cc5   :  { %2742 = vtanh.f32 %v1984_v36 }
0x2ccf   :  { %v2743_v37 = vpop.eup %2742 }
0x2cd0   :  { %1987 = vrot.lane.b32.xlu0 %v2743_v37, %s2950_s8 }
0x2d42   :  { %v1988_v44 = vpop.permute.xlu0 %1987 }
0x2d43   :  { %v1990_v45 = vmul.f32 %v2741_v29, %v1988_v44 }
0x2d45   :  { %1992 = vrot.lane.b32.xlu1 %v1990_v45, %s2951_s17 }
0x2db7   :  { %v1993_v46 = vpop.permute.xlu1 %1992 }
0x2db8   :  { %1995 = vst.msk [vmem:[#allocation3 + $0xe] sm:$0x3] %vm325_vm2, %v1993_v46 }
0x2dbf   :  { %v1997_v47 = vld [vmem:[#allocation3 + $0x8] sm:$0xff] }
0x2dc0   :  { %v2006_v48 = vmul.f32 %v3333_v58, %v1997_v47 }
0x2dc2   :  { %v2015_v49 = vadd.f32 %v3336_v60, %v2006_v48 }
0x2dc4   :  { %2511 = vmatmul.mubr.msk.f32.vlgmr.msra.gmra.mrb[18].mxu0 %vm137_vm1, %v2015_v49 }
0x2e97   :  { %v2512_v52 = vpop.f32.mrb[18].mxu0 }
0x2e98   :  { %v2092_v12 = vpop.f32.mrb[19].mxu0  ;;  %v2105_v1 = vsel %vm2103_vm3, %v2512_v52, -1e+30 }
0x2e99   :  { %2108 = vmax.xlane.f32.xlu1 %v2105_v1  ;;  %v2104_v0 = vsel %vm2103_vm3, %v2092_v12, -1e+30 }
0x2e9a   :  { %2106 = vmax.xlane.f32.xlu0 %v2104_v0 }
0x2f26   :  { %v2109_v62 = vpop.xlane.xlu1 %2108 }
0x2f27   :  { %v2107_v53 = vpop.xlane.xlu0 %2106  ;;  %v2111_v54 = vsub.f32 %v2105_v1, %v2109_v62 }
0x2f28   :  { %v2110_v55 = vsub.f32 %v2104_v0, %v2107_v53 }
0x2f29   :  { %v2114_v57 = vmul.f32 1.442695, %v2111_v54 }
0x2f2a   :  { %v2112_v56 = vmul.f32 1.442695, %v2110_v55 }
0x2f2c   :  { %2744 = vpow2.f32 %v2112_v56 }
0x2f2d   :  { %2746 = vpow2.f32 %v2114_v57 }
0x2f36   :  { %v2745_v58 = vpop.eup %2744 }
0x2f37   :  { %2116 = vadd.xlane.f32.xlu0 %v2745_v58  ;;  %v2747_v59 = vpop.eup %2746 }
0x2f3b   :  { %2118 = vadd.xlane.f32.xlu0 %v2747_v59 }
0x2fc4   :  { %v2117_v60 = vpop.xlane.xlu0 %2116 }
0x2fc5   :  { %2748 = vlog2.f32 %v2117_v60 }
0x2fc8   :  { %v2119_v61 = vpop.xlane.xlu0 %2118 }
0x2fc9   :  { %2750 = vlog2.f32 %v2119_v61 }
0x2fcf   :  { %v2749_v63 = vpop.eup %2748 }
0x2fd0   :  { %v2121_v14 = vmul.f32 0.6931472, %v2749_v63 }
0x2fd2   :  { %v2124_v2 = vadd.f32 %v2121_v14, %v2107_v53 }
0x2fd3   :  { %v2751_v3 = vpop.eup %2750 }
0x2fd4   :  { %v2123_v4 = vmul.f32 0.6931472, %v2751_v3  ;;  %v2126_v5 = vsub.f32 %v2092_v12, %v2124_v2 }
0x2fd6   :  { %v2125_v6 = vadd.f32 %v2123_v4, %v2109_v62  ;;  %2128 = vst [vmem:[#allocation16] sm:$0xff] %v2126_v5 }
0x2fd8   :  { %v2127_v7 = vsub.f32 %v2512_v52, %v2125_v6 }
0x2fda   :  { %2129 = vst [vmem:[#allocation16 + $0x8] sm:$0xff] %v2127_v7 }
0x2fdb   :  { %2917 = shalt.err (!%p2914_p4)
}
0x2fdc   :  { %s2918_s5 = scalar_lea.hbm %s3393_s10, 256 }
0x2fdd   :  { %p2919_p5 = scmp.ne.s32.totalorder %s3393_s10, %s2918_s5  ;;  %p2922_p6 = scmp.lt.u32.totalorder %s2918_s5, %s3393_s10 }
0x2fdf   :  { %p2924_p7 = pnand %p2922_p6, %p2919_p5 }
0x2fe1   :  { %2927 = shalt.err (!%p2924_p7)
}
0x2fe2   :  { %2141 = dma.vmem_to_hbm [thread:$0]  %s2136_s27, 256, %s3393_s10, [#allocation6], %s2940_s25, %s2940_s25, %s2941_s26  }
0x2fe3   :  { %2936 = dma.done.wait [#allocation6], 256  }
0x2fe4   :  { %2937 = vsyncadd [#allocation6], 4294967040 }
0x2fe5   :  { %2145 = vsyncpa [#allocation5], 1 }
0x2fe6   :  { %2146 = vsyncpa [#allocation8], 1 }
0x2fe7   :  { %2147 = vsyncpa [#allocation11], 1 }
0x2fe8   :  { %2148 = vsyncpa [#allocation14], 1 }
0x2fe9   :  { %2149 = vsyncpa [#allocation6], 1 }

</bundles_post_ra>
